<compile_context>
chip_gen: v5e
topology: v5e:2x2
jax: 0.10.0
libtpu: 0.0.40
codegen_flags: <defaults>
</compile_context>

<pallas_src>
import functools

import jax
import jax.numpy as jnp
from jax.experimental import pallas as pl
from jax.experimental.pallas import tpu as pltpu


def _mha_kernel(x_ref, wq_ref, wk_ref, wv_ref, bq_ref, bk_ref, bv_ref,
                wp_ref, bp_ref, o_ref, *, num_heads, inv_scale):
    """One grid step = one batch element.  Full sequence resident in VMEM."""
    x = x_ref[0]                                   # (N, E) f32
    n, e = x.shape
    acc = jnp.zeros((n, e), jnp.float32)           # projected-output accumulator

    for h in range(num_heads):                     # static unroll (H = 5)
        q = jnp.dot(x, wq_ref[h], preferred_element_type=jnp.float32) + bq_ref[h]
        k = jnp.dot(x, wk_ref[h], preferred_element_type=jnp.float32) + bk_ref[h]
        v = jnp.dot(x, wv_ref[h], preferred_element_type=jnp.float32) + bv_ref[h]

        energy = jnp.einsum('qd,kd->qk', q, k,
                            preferred_element_type=jnp.float32)        # (N, N)
        m = jnp.max(energy, axis=-1, keepdims=True)
        p = jnp.exp(energy - m)
        att = (p / jnp.sum(p, axis=-1, keepdims=True)) * inv_scale     # softmax, THEN /sqrt(E)

        out_h = jnp.dot(att, v, preferred_element_type=jnp.float32)    # (N, D)
        # head-recombine + projection fused: out_h @ Wproj[h*D:(h+1)*D, :]
        acc = acc + jnp.dot(out_h, wp_ref[h], preferred_element_type=jnp.float32)

    o_ref[0] = (acc + bp_ref[...]).astype(o_ref.dtype)


def prepare_params(w_qkv, b_qkv, w_proj, b_proj, num_heads):
    """One-time (outside the hot path) permutation of torch-layout weights.

    w_qkv: (3E, E) with output feature p = h*(D*3) + d*3 + qkv  (einops '(h d qkv)')
    Returns head-separated (in, out)-layout weights the kernel can use directly.
    """
    three_e, e = w_qkv.shape
    d = e // num_heads
    w = w_qkv.reshape(num_heads, d, 3, e)                  # (H, D, 3, E)
    b = b_qkv.reshape(num_heads, d, 3)                     # (H, D, 3)
    wq = jnp.transpose(w[:, :, 0, :], (0, 2, 1))           # (H, E, D)
    wk = jnp.transpose(w[:, :, 1, :], (0, 2, 1))
    wv = jnp.transpose(w[:, :, 2, :], (0, 2, 1))
    bq = b[:, :, 0].reshape(num_heads, 1, d)               # (H, 1, D)
    bk = b[:, :, 1].reshape(num_heads, 1, d)
    bv = b[:, :, 2].reshape(num_heads, 1, d)
    wp = jnp.transpose(w_proj).reshape(num_heads, d, e)    # (H, D, E); in-feature = h*D+d
    bp = b_proj.reshape(1, e)                              # (1, E)
    return wq, wk, wv, bq, bk, bv, wp, bp


@jax.jit
def mha_forward(x, wq, wk, wv, bq, bk, bv, wp, bp):
    """x: (B, N, E) float32 -> (B, N, E) float32."""
    B, N, E = x.shape
    H, _, D = wq.shape

    grid_spec = pltpu.PrefetchScalarGridSpec(
        num_scalar_prefetch=0,
        grid=(B,),
        in_specs=[
            pl.BlockSpec((1, N, E), lambda b: (b, 0, 0)),   # x: per-batch block
            pl.BlockSpec((H, E, D), lambda b: (0, 0, 0)),   # Wq (resident)
            pl.BlockSpec((H, E, D), lambda b: (0, 0, 0)),   # Wk
            pl.BlockSpec((H, E, D), lambda b: (0, 0, 0)),   # Wv
            pl.BlockSpec((H, 1, D), lambda b: (0, 0, 0)),   # bq
            pl.BlockSpec((H, 1, D), lambda b: (0, 0, 0)),   # bk
            pl.BlockSpec((H, 1, D), lambda b: (0, 0, 0)),   # bv
            pl.BlockSpec((H, D, E), lambda b: (0, 0, 0)),   # Wproj (head-sliced)
            pl.BlockSpec((1, E), lambda b: (0, 0)),         # bproj
        ],
        out_specs=pl.BlockSpec((1, N, E), lambda b: (b, 0, 0)),
    )

    kernel = functools.partial(_mha_kernel, num_heads=H,
                               inv_scale=1.0 / float(E) ** 0.5)

    return pl.pallas_call(
        kernel,
        out_shape=jax.ShapeDtypeStruct((B, N, E), x.dtype),
        grid_spec=grid_spec,
        compiler_params=pltpu.CompilerParams(
            dimension_semantics=("parallel",),   # batch can split across TCs (v7x megacore)
        ),
    )(x, wq, wk, wv, bq, bk, bv, wp, bp)


def reference_forward(x, w_qkv, b_qkv, w_proj, b_proj, emb_size, num_heads):
    """Pure-JAX replica of the PyTorch forward (mask=None, dropout=0)."""
    B, N, E = x.shape
    D = E // num_heads
    y = x @ w_qkv.T + b_qkv                                 # (B, N, 3E)
    y = y.reshape(B, N, num_heads, D, 3)                    # 'b n (h d qkv)'
    q = jnp.transpose(y[..., 0], (0, 2, 1, 3))              # (B, H, N, D)
    k = jnp.transpose(y[..., 1], (0, 2, 1, 3))
    v = jnp.transpose(y[..., 2], (0, 2, 1, 3))
    energy = jnp.einsum('bhqd,bhkd->bhqk', q, k)
    att = jax.nn.softmax(energy, axis=-1) / (emb_size ** 0.5)
    out = jnp.einsum('bhqk,bhkd->bhqd', att, v)
    out = jnp.transpose(out, (0, 2, 1, 3)).reshape(B, N, E)
    return out @ w_proj.T + b_proj


if __name__ == "__main__":
    EMB, HEADS = 80, 5          # module defaults: emb_size=80, num_heads=5
    B, N = 2, 8                 # small demo shapes

    key = jax.random.PRNGKey(0)
    kx, kw1, kb1, kw2, kb2 = jax.random.split(key, 5)
    bound = 1.0 / (EMB ** 0.5)
    x = jax.random.normal(kx, (B, N, EMB), jnp.float32)
    w_qkv = jax.random.uniform(kw1, (3 * EMB, EMB), jnp.float32, -bound, bound)
    b_qkv = jax.random.uniform(kb1, (3 * EMB,), jnp.float32, -bound, bound)
    w_proj = jax.random.uniform(kw2, (EMB, EMB), jnp.float32, -bound, bound)
    b_proj = jax.random.uniform(kb2, (EMB,), jnp.float32, -bound, bound)

    # One-time weight permutation (hoisted out of the per-call hot path).
    params = prepare_params(w_qkv, b_qkv, w_proj, b_proj, HEADS)

    out = mha_forward(x, *params)
    out = jax.block_until_ready(out)

    ref = reference_forward(x, w_qkv, b_qkv, w_proj, b_proj, EMB, HEADS)
    assert out.shape == (B, N, EMB)
    assert jnp.allclose(out, ref, atol=1e-4, rtol=1e-4), float(jnp.max(jnp.abs(out - ref)))

    print("KERNEL_OK")
</pallas_src>

<mosaic_0001>
module attributes {stable_mosaic.version = 11 : i64} {
  func.func @_mha_kernel(%arg0: i32, %arg1: memref<1x8x80xf32, #tpu.memory_space<vmem>>, %arg2: memref<5x80x16xf32, #tpu.memory_space<vmem>>, %arg3: memref<5x80x16xf32, #tpu.memory_space<vmem>>, %arg4: memref<5x80x16xf32, #tpu.memory_space<vmem>>, %arg5: memref<5x1x16xf32, #tpu.memory_space<vmem>>, %arg6: memref<5x1x16xf32, #tpu.memory_space<vmem>>, %arg7: memref<5x1x16xf32, #tpu.memory_space<vmem>>, %arg8: memref<5x16x80xf32, #tpu.memory_space<vmem>>, %arg9: memref<1x80xf32, #tpu.memory_space<vmem>>, %arg10: memref<1x8x80xf32, #tpu.memory_space<vmem>>) attributes {dimension_semantics = [#tpu.dimension_semantics<parallel>], iteration_bounds = array<i64: 2>, scalar_prefetch = 0 : i64, scratch_operands = 0 : i64, tpu.core_type = #tpu.core_type<tc>, window_params = [{transform_indices = @transform_0, window_bounds = array<i64: 1, 8, 80>}, {pipeline_mode = #tpu.pipeline_mode<synchronous>, transform_indices = @transform_1, window_bounds = array<i64: 5, 80, 16>}, {pipeline_mode = #tpu.pipeline_mode<synchronous>, transform_indices = @transform_2, window_bounds = array<i64: 5, 80, 16>}, {pipeline_mode = #tpu.pipeline_mode<synchronous>, transform_indices = @transform_3, window_bounds = array<i64: 5, 80, 16>}, {pipeline_mode = #tpu.pipeline_mode<synchronous>, transform_indices = @transform_4, window_bounds = array<i64: 5, 1, 16>}, {pipeline_mode = #tpu.pipeline_mode<synchronous>, transform_indices = @transform_5, window_bounds = array<i64: 5, 1, 16>}, {pipeline_mode = #tpu.pipeline_mode<synchronous>, transform_indices = @transform_6, window_bounds = array<i64: 5, 1, 16>}, {pipeline_mode = #tpu.pipeline_mode<synchronous>, transform_indices = @transform_7, window_bounds = array<i64: 5, 16, 80>}, {pipeline_mode = #tpu.pipeline_mode<synchronous>, transform_indices = @transform_8, window_bounds = array<i64: 1, 80>}, {transform_indices = @transform_9, window_bounds = array<i64: 1, 8, 80>}]} {
    %c0 = arith.constant 0 : index
    %c0_0 = arith.constant 0 : index
    %c0_1 = arith.constant 0 : index
    %0 = vector.load %arg1[%c0, %c0_0, %c0_1] : memref<1x8x80xf32, #tpu.memory_space<vmem>>, vector<1x8x80xf32>
    %1 = vector.shape_cast %0 : vector<1x8x80xf32> to vector<8x80xf32>
    %cst = arith.constant 0.000000e+00 : f32
    %2 = vector.broadcast %cst : f32 to vector<8x80xf32>
    %c0_2 = arith.constant 0 : index
    %c0_3 = arith.constant 0 : index
    %c0_4 = arith.constant 0 : index
    %3 = vector.load %arg2[%c0_2, %c0_3, %c0_4] : memref<5x80x16xf32, #tpu.memory_space<vmem>>, vector<1x80x16xf32>
    %4 = vector.shape_cast %3 : vector<1x80x16xf32> to vector<80x16xf32>
    %cst_5 = arith.constant dense<0.000000e+00> : vector<8x16xf32>
    %5 = tpu.matmul %1, %4, %cst_5 {dimension_numbers = #tpu.dot_dimension_numbers<[1], [0], [0], [1], [0, 0, 1, 1], [], []>} : vector<8x80xf32>, vector<80x16xf32>, vector<8x16xf32> -> vector<8x16xf32>
    %c0_6 = arith.constant 0 : index
    %c0_7 = arith.constant 0 : index
    %c0_8 = arith.constant 0 : index
    %6 = vector.load %arg5[%c0_6, %c0_7, %c0_8] : memref<5x1x16xf32, #tpu.memory_space<vmem>>, vector<1x1x16xf32>
    %7 = vector.shape_cast %6 : vector<1x1x16xf32> to vector<1x16xf32>
    %8 = vector.broadcast %7 : vector<1x16xf32> to vector<8x16xf32>
    %9 = arith.addf %5, %8 : vector<8x16xf32>
    %c0_9 = arith.constant 0 : index
    %c0_10 = arith.constant 0 : index
    %c0_11 = arith.constant 0 : index
    %10 = vector.load %arg3[%c0_9, %c0_10, %c0_11] : memref<5x80x16xf32, #tpu.memory_space<vmem>>, vector<1x80x16xf32>
    %11 = vector.shape_cast %10 : vector<1x80x16xf32> to vector<80x16xf32>
    %cst_12 = arith.constant dense<0.000000e+00> : vector<8x16xf32>
    %12 = tpu.matmul %1, %11, %cst_12 {dimension_numbers = #tpu.dot_dimension_numbers<[1], [0], [0], [1], [0, 0, 1, 1], [], []>} : vector<8x80xf32>, vector<80x16xf32>, vector<8x16xf32> -> vector<8x16xf32>
    %c0_13 = arith.constant 0 : index
    %c0_14 = arith.constant 0 : index
    %c0_15 = arith.constant 0 : index
    %13 = vector.load %arg6[%c0_13, %c0_14, %c0_15] : memref<5x1x16xf32, #tpu.memory_space<vmem>>, vector<1x1x16xf32>
    %14 = vector.shape_cast %13 : vector<1x1x16xf32> to vector<1x16xf32>
    %15 = vector.broadcast %14 : vector<1x16xf32> to vector<8x16xf32>
    %16 = arith.addf %12, %15 : vector<8x16xf32>
    %c0_16 = arith.constant 0 : index
    %c0_17 = arith.constant 0 : index
    %c0_18 = arith.constant 0 : index
    %17 = vector.load %arg4[%c0_16, %c0_17, %c0_18] : memref<5x80x16xf32, #tpu.memory_space<vmem>>, vector<1x80x16xf32>
    %18 = vector.shape_cast %17 : vector<1x80x16xf32> to vector<80x16xf32>
    %cst_19 = arith.constant dense<0.000000e+00> : vector<8x16xf32>
    %19 = tpu.matmul %1, %18, %cst_19 {dimension_numbers = #tpu.dot_dimension_numbers<[1], [0], [0], [1], [0, 0, 1, 1], [], []>} : vector<8x80xf32>, vector<80x16xf32>, vector<8x16xf32> -> vector<8x16xf32>
    %c0_20 = arith.constant 0 : index
    %c0_21 = arith.constant 0 : index
    %c0_22 = arith.constant 0 : index
    %20 = vector.load %arg7[%c0_20, %c0_21, %c0_22] : memref<5x1x16xf32, #tpu.memory_space<vmem>>, vector<1x1x16xf32>
    %21 = vector.shape_cast %20 : vector<1x1x16xf32> to vector<1x16xf32>
    %22 = vector.broadcast %21 : vector<1x16xf32> to vector<8x16xf32>
    %23 = arith.addf %19, %22 : vector<8x16xf32>
    "tpu.trace_start"() <{level = 10 : i32, message = "qd,kd->qk"}> : () -> ()
    %cst_23 = arith.constant dense<0.000000e+00> : vector<8x8xf32>
    %24 = tpu.matmul %9, %16, %cst_23 {dimension_numbers = #tpu.dot_dimension_numbers<[1], [1], [0], [0], [0, 0, 1, 0], [], []>} : vector<8x16xf32>, vector<8x16xf32>, vector<8x8xf32> -> vector<8x8xf32>
    "tpu.trace_stop"() : () -> ()
    %cst_24 = arith.constant dense<0xFF800000> : vector<8xf32>
    %25 = vector.multi_reduction <maximumf>, %24, %cst_24 [1] : vector<8x8xf32> to vector<8xf32>
    %26 = vector.shape_cast %25 : vector<8xf32> to vector<8x1xf32>
    %27 = vector.broadcast %26 : vector<8x1xf32> to vector<8x8xf32>
    %28 = arith.subf %24, %27 : vector<8x8xf32>
    %29 = math.exp %28 : vector<8x8xf32>
    %cst_25 = arith.constant dense<0.000000e+00> : vector<8xf32>
    %30 = vector.multi_reduction <add>, %29, %cst_25 [1] : vector<8x8xf32> to vector<8xf32>
    %31 = vector.shape_cast %30 : vector<8xf32> to vector<8x1xf32>
    %32 = vector.broadcast %31 : vector<8x1xf32> to vector<8x8xf32>
    %33 = arith.divf %29, %32 : vector<8x8xf32>
    %cst_26 = arith.constant 0.111803398 : f32
    %34 = vector.broadcast %cst_26 : f32 to vector<8x8xf32>
    %35 = arith.mulf %33, %34 : vector<8x8xf32>
    %cst_27 = arith.constant dense<0.000000e+00> : vector<8x16xf32>
    %36 = tpu.matmul %35, %23, %cst_27 {dimension_numbers = #tpu.dot_dimension_numbers<[1], [0], [0], [1], [0, 0, 1, 1], [], []>} : vector<8x8xf32>, vector<8x16xf32>, vector<8x16xf32> -> vector<8x16xf32>
    %c0_28 = arith.constant 0 : index
    %c0_29 = arith.constant 0 : index
    %c0_30 = arith.constant 0 : index
    %37 = vector.load %arg8[%c0_28, %c0_29, %c0_30] : memref<5x16x80xf32, #tpu.memory_space<vmem>>, vector<1x16x80xf32>
    %38 = vector.shape_cast %37 : vector<1x16x80xf32> to vector<16x80xf32>
    %cst_31 = arith.constant dense<0.000000e+00> : vector<8x80xf32>
    %39 = tpu.matmul %36, %38, %cst_31 {dimension_numbers = #tpu.dot_dimension_numbers<[1], [0], [0], [1], [0, 0, 1, 1], [], []>} : vector<8x16xf32>, vector<16x80xf32>, vector<8x80xf32> -> vector<8x80xf32>
    %40 = arith.addf %2, %39 : vector<8x80xf32>
    %c1 = arith.constant 1 : index
    %c0_32 = arith.constant 0 : index
    %c0_33 = arith.constant 0 : index
    %41 = vector.load %arg2[%c1, %c0_32, %c0_33] : memref<5x80x16xf32, #tpu.memory_space<vmem>>, vector<1x80x16xf32>
    %42 = vector.shape_cast %41 : vector<1x80x16xf32> to vector<80x16xf32>
    %cst_34 = arith.constant dense<0.000000e+00> : vector<8x16xf32>
    %43 = tpu.matmul %1, %42, %cst_34 {dimension_numbers = #tpu.dot_dimension_numbers<[1], [0], [0], [1], [0, 0, 1, 1], [], []>} : vector<8x80xf32>, vector<80x16xf32>, vector<8x16xf32> -> vector<8x16xf32>
    %c1_35 = arith.constant 1 : index
    %c0_36 = arith.constant 0 : index
    %c0_37 = arith.constant 0 : index
    %44 = vector.load %arg5[%c1_35, %c0_36, %c0_37] : memref<5x1x16xf32, #tpu.memory_space<vmem>>, vector<1x1x16xf32>
    %45 = vector.shape_cast %44 : vector<1x1x16xf32> to vector<1x16xf32>
    %46 = vector.broadcast %45 : vector<1x16xf32> to vector<8x16xf32>
    %47 = arith.addf %43, %46 : vector<8x16xf32>
    %c1_38 = arith.constant 1 : index
    %c0_39 = arith.constant 0 : index
    %c0_40 = arith.constant 0 : index
    %48 = vector.load %arg3[%c1_38, %c0_39, %c0_40] : memref<5x80x16xf32, #tpu.memory_space<vmem>>, vector<1x80x16xf32>
    %49 = vector.shape_cast %48 : vector<1x80x16xf32> to vector<80x16xf32>
    %cst_41 = arith.constant dense<0.000000e+00> : vector<8x16xf32>
    %50 = tpu.matmul %1, %49, %cst_41 {dimension_numbers = #tpu.dot_dimension_numbers<[1], [0], [0], [1], [0, 0, 1, 1], [], []>} : vector<8x80xf32>, vector<80x16xf32>, vector<8x16xf32> -> vector<8x16xf32>
    %c1_42 = arith.constant 1 : index
    %c0_43 = arith.constant 0 : index
    %c0_44 = arith.constant 0 : index
    %51 = vector.load %arg6[%c1_42, %c0_43, %c0_44] : memref<5x1x16xf32, #tpu.memory_space<vmem>>, vector<1x1x16xf32>
    %52 = vector.shape_cast %51 : vector<1x1x16xf32> to vector<1x16xf32>
    %53 = vector.broadcast %52 : vector<1x16xf32> to vector<8x16xf32>
    %54 = arith.addf %50, %53 : vector<8x16xf32>
    %c1_45 = arith.constant 1 : index
    %c0_46 = arith.constant 0 : index
    %c0_47 = arith.constant 0 : index
    %55 = vector.load %arg4[%c1_45, %c0_46, %c0_47] : memref<5x80x16xf32, #tpu.memory_space<vmem>>, vector<1x80x16xf32>
    %56 = vector.shape_cast %55 : vector<1x80x16xf32> to vector<80x16xf32>
    %cst_48 = arith.constant dense<0.000000e+00> : vector<8x16xf32>
    %57 = tpu.matmul %1, %56, %cst_48 {dimension_numbers = #tpu.dot_dimension_numbers<[1], [0], [0], [1], [0, 0, 1, 1], [], []>} : vector<8x80xf32>, vector<80x16xf32>, vector<8x16xf32> -> vector<8x16xf32>
    %c1_49 = arith.constant 1 : index
    %c0_50 = arith.constant 0 : index
    %c0_51 = arith.constant 0 : index
    %58 = vector.load %arg7[%c1_49, %c0_50, %c0_51] : memref<5x1x16xf32, #tpu.memory_space<vmem>>, vector<1x1x16xf32>
    %59 = vector.shape_cast %58 : vector<1x1x16xf32> to vector<1x16xf32>
    %60 = vector.broadcast %59 : vector<1x16xf32> to vector<8x16xf32>
    %61 = arith.addf %57, %60 : vector<8x16xf32>
    "tpu.trace_start"() <{level = 10 : i32, message = "qd,kd->qk"}> : () -> ()
    %cst_52 = arith.constant dense<0.000000e+00> : vector<8x8xf32>
    %62 = tpu.matmul %47, %54, %cst_52 {dimension_numbers = #tpu.dot_dimension_numbers<[1], [1], [0], [0], [0, 0, 1, 0], [], []>} : vector<8x16xf32>, vector<8x16xf32>, vector<8x8xf32> -> vector<8x8xf32>
    "tpu.trace_stop"() : () -> ()
    %cst_53 = arith.constant dense<0xFF800000> : vector<8xf32>
    %63 = vector.multi_reduction <maximumf>, %62, %cst_53 [1] : vector<8x8xf32> to vector<8xf32>
    %64 = vector.shape_cast %63 : vector<8xf32> to vector<8x1xf32>
    %65 = vector.broadcast %64 : vector<8x1xf32> to vector<8x8xf32>
    %66 = arith.subf %62, %65 : vector<8x8xf32>
    %67 = math.exp %66 : vector<8x8xf32>
    %cst_54 = arith.constant dense<0.000000e+00> : vector<8xf32>
    %68 = vector.multi_reduction <add>, %67, %cst_54 [1] : vector<8x8xf32> to vector<8xf32>
    %69 = vector.shape_cast %68 : vector<8xf32> to vector<8x1xf32>
    %70 = vector.broadcast %69 : vector<8x1xf32> to vector<8x8xf32>
    %71 = arith.divf %67, %70 : vector<8x8xf32>
    %cst_55 = arith.constant 0.111803398 : f32
    %72 = vector.broadcast %cst_55 : f32 to vector<8x8xf32>
    %73 = arith.mulf %71, %72 : vector<8x8xf32>
    %cst_56 = arith.constant dense<0.000000e+00> : vector<8x16xf32>
    %74 = tpu.matmul %73, %61, %cst_56 {dimension_numbers = #tpu.dot_dimension_numbers<[1], [0], [0], [1], [0, 0, 1, 1], [], []>} : vector<8x8xf32>, vector<8x16xf32>, vector<8x16xf32> -> vector<8x16xf32>
    %c1_57 = arith.constant 1 : index
    %c0_58 = arith.constant 0 : index
    %c0_59 = arith.constant 0 : index
    %75 = vector.load %arg8[%c1_57, %c0_58, %c0_59] : memref<5x16x80xf32, #tpu.memory_space<vmem>>, vector<1x16x80xf32>
    %76 = vector.shape_cast %75 : vector<1x16x80xf32> to vector<16x80xf32>
    %cst_60 = arith.constant dense<0.000000e+00> : vector<8x80xf32>
    %77 = tpu.matmul %74, %76, %cst_60 {dimension_numbers = #tpu.dot_dimension_numbers<[1], [0], [0], [1], [0, 0, 1, 1], [], []>} : vector<8x16xf32>, vector<16x80xf32>, vector<8x80xf32> -> vector<8x80xf32>
    %78 = arith.addf %40, %77 : vector<8x80xf32>
    %c2 = arith.constant 2 : index
    %c0_61 = arith.constant 0 : index
    %c0_62 = arith.constant 0 : index
    %79 = vector.load %arg2[%c2, %c0_61, %c0_62] : memref<5x80x16xf32, #tpu.memory_space<vmem>>, vector<1x80x16xf32>
    %80 = vector.shape_cast %79 : vector<1x80x16xf32> to vector<80x16xf32>
    %cst_63 = arith.constant dense<0.000000e+00> : vector<8x16xf32>
    %81 = tpu.matmul %1, %80, %cst_63 {dimension_numbers = #tpu.dot_dimension_numbers<[1], [0], [0], [1], [0, 0, 1, 1], [], []>} : vector<8x80xf32>, vector<80x16xf32>, vector<8x16xf32> -> vector<8x16xf32>
    %c2_64 = arith.constant 2 : index
    %c0_65 = arith.constant 0 : index
    %c0_66 = arith.constant 0 : index
    %82 = vector.load %arg5[%c2_64, %c0_65, %c0_66] : memref<5x1x16xf32, #tpu.memory_space<vmem>>, vector<1x1x16xf32>
    %83 = vector.shape_cast %82 : vector<1x1x16xf32> to vector<1x16xf32>
    %84 = vector.broadcast %83 : vector<1x16xf32> to vector<8x16xf32>
    %85 = arith.addf %81, %84 : vector<8x16xf32>
    %c2_67 = arith.constant 2 : index
    %c0_68 = arith.constant 0 : index
    %c0_69 = arith.constant 0 : index
    %86 = vector.load %arg3[%c2_67, %c0_68, %c0_69] : memref<5x80x16xf32, #tpu.memory_space<vmem>>, vector<1x80x16xf32>
    %87 = vector.shape_cast %86 : vector<1x80x16xf32> to vector<80x16xf32>
    %cst_70 = arith.constant dense<0.000000e+00> : vector<8x16xf32>
    %88 = tpu.matmul %1, %87, %cst_70 {dimension_numbers = #tpu.dot_dimension_numbers<[1], [0], [0], [1], [0, 0, 1, 1], [], []>} : vector<8x80xf32>, vector<80x16xf32>, vector<8x16xf32> -> vector<8x16xf32>
    %c2_71 = arith.constant 2 : index
    %c0_72 = arith.constant 0 : index
    %c0_73 = arith.constant 0 : index
    %89 = vector.load %arg6[%c2_71, %c0_72, %c0_73] : memref<5x1x16xf32, #tpu.memory_space<vmem>>, vector<1x1x16xf32>
    %90 = vector.shape_cast %89 : vector<1x1x16xf32> to vector<1x16xf32>
    %91 = vector.broadcast %90 : vector<1x16xf32> to vector<8x16xf32>
    %92 = arith.addf %88, %91 : vector<8x16xf32>
    %c2_74 = arith.constant 2 : index
    %c0_75 = arith.constant 0 : index
    %c0_76 = arith.constant 0 : index
    %93 = vector.load %arg4[%c2_74, %c0_75, %c0_76] : memref<5x80x16xf32, #tpu.memory_space<vmem>>, vector<1x80x16xf32>
    %94 = vector.shape_cast %93 : vector<1x80x16xf32> to vector<80x16xf32>
    %cst_77 = arith.constant dense<0.000000e+00> : vector<8x16xf32>
    %95 = tpu.matmul %1, %94, %cst_77 {dimension_numbers = #tpu.dot_dimension_numbers<[1], [0], [0], [1], [0, 0, 1, 1], [], []>} : vector<8x80xf32>, vector<80x16xf32>, vector<8x16xf32> -> vector<8x16xf32>
    %c2_78 = arith.constant 2 : index
    %c0_79 = arith.constant 0 : index
    %c0_80 = arith.constant 0 : index
    %96 = vector.load %arg7[%c2_78, %c0_79, %c0_80] : memref<5x1x16xf32, #tpu.memory_space<vmem>>, vector<1x1x16xf32>
    %97 = vector.shape_cast %96 : vector<1x1x16xf32> to vector<1x16xf32>
    %98 = vector.broadcast %97 : vector<1x16xf32> to vector<8x16xf32>
    %99 = arith.addf %95, %98 : vector<8x16xf32>
    "tpu.trace_start"() <{level = 10 : i32, message = "qd,kd->qk"}> : () -> ()
    %cst_81 = arith.constant dense<0.000000e+00> : vector<8x8xf32>
    %100 = tpu.matmul %85, %92, %cst_81 {dimension_numbers = #tpu.dot_dimension_numbers<[1], [1], [0], [0], [0, 0, 1, 0], [], []>} : vector<8x16xf32>, vector<8x16xf32>, vector<8x8xf32> -> vector<8x8xf32>
    "tpu.trace_stop"() : () -> ()
    %cst_82 = arith.constant dense<0xFF800000> : vector<8xf32>
    %101 = vector.multi_reduction <maximumf>, %100, %cst_82 [1] : vector<8x8xf32> to vector<8xf32>
    %102 = vector.shape_cast %101 : vector<8xf32> to vector<8x1xf32>
    %103 = vector.broadcast %102 : vector<8x1xf32> to vector<8x8xf32>
    %104 = arith.subf %100, %103 : vector<8x8xf32>
    %105 = math.exp %104 : vector<8x8xf32>
    %cst_83 = arith.constant dense<0.000000e+00> : vector<8xf32>
    %106 = vector.multi_reduction <add>, %105, %cst_83 [1] : vector<8x8xf32> to vector<8xf32>
    %107 = vector.shape_cast %106 : vector<8xf32> to vector<8x1xf32>
    %108 = vector.broadcast %107 : vector<8x1xf32> to vector<8x8xf32>
    %109 = arith.divf %105, %108 : vector<8x8xf32>
    %cst_84 = arith.constant 0.111803398 : f32
    %110 = vector.broadcast %cst_84 : f32 to vector<8x8xf32>
    %111 = arith.mulf %109, %110 : vector<8x8xf32>
    %cst_85 = arith.constant dense<0.000000e+00> : vector<8x16xf32>
    %112 = tpu.matmul %111, %99, %cst_85 {dimension_numbers = #tpu.dot_dimension_numbers<[1], [0], [0], [1], [0, 0, 1, 1], [], []>} : vector<8x8xf32>, vector<8x16xf32>, vector<8x16xf32> -> vector<8x16xf32>
    %c2_86 = arith.constant 2 : index
    %c0_87 = arith.constant 0 : index
    %c0_88 = arith.constant 0 : index
    %113 = vector.load %arg8[%c2_86, %c0_87, %c0_88] : memref<5x16x80xf32, #tpu.memory_space<vmem>>, vector<1x16x80xf32>
    %114 = vector.shape_cast %113 : vector<1x16x80xf32> to vector<16x80xf32>
    %cst_89 = arith.constant dense<0.000000e+00> : vector<8x80xf32>
    %115 = tpu.matmul %112, %114, %cst_89 {dimension_numbers = #tpu.dot_dimension_numbers<[1], [0], [0], [1], [0, 0, 1, 1], [], []>} : vector<8x16xf32>, vector<16x80xf32>, vector<8x80xf32> -> vector<8x80xf32>
    %116 = arith.addf %78, %115 : vector<8x80xf32>
    %c3 = arith.constant 3 : index
    %c0_90 = arith.constant 0 : index
    %c0_91 = arith.constant 0 : index
    %117 = vector.load %arg2[%c3, %c0_90, %c0_91] : memref<5x80x16xf32, #tpu.memory_space<vmem>>, vector<1x80x16xf32>
    %118 = vector.shape_cast %117 : vector<1x80x16xf32> to vector<80x16xf32>
    %cst_92 = arith.constant dense<0.000000e+00> : vector<8x16xf32>
    %119 = tpu.matmul %1, %118, %cst_92 {dimension_numbers = #tpu.dot_dimension_numbers<[1], [0], [0], [1], [0, 0, 1, 1], [], []>} : vector<8x80xf32>, vector<80x16xf32>, vector<8x16xf32> -> vector<8x16xf32>
    %c3_93 = arith.constant 3 : index
    %c0_94 = arith.constant 0 : index
    %c0_95 = arith.constant 0 : index
    %120 = vector.load %arg5[%c3_93, %c0_94, %c0_95] : memref<5x1x16xf32, #tpu.memory_space<vmem>>, vector<1x1x16xf32>
    %121 = vector.shape_cast %120 : vector<1x1x16xf32> to vector<1x16xf32>
    %122 = vector.broadcast %121 : vector<1x16xf32> to vector<8x16xf32>
    %123 = arith.addf %119, %122 : vector<8x16xf32>
    %c3_96 = arith.constant 3 : index
    %c0_97 = arith.constant 0 : index
    %c0_98 = arith.constant 0 : index
    %124 = vector.load %arg3[%c3_96, %c0_97, %c0_98] : memref<5x80x16xf32, #tpu.memory_space<vmem>>, vector<1x80x16xf32>
    %125 = vector.shape_cast %124 : vector<1x80x16xf32> to vector<80x16xf32>
    %cst_99 = arith.constant dense<0.000000e+00> : vector<8x16xf32>
    %126 = tpu.matmul %1, %125, %cst_99 {dimension_numbers = #tpu.dot_dimension_numbers<[1], [0], [0], [1], [0, 0, 1, 1], [], []>} : vector<8x80xf32>, vector<80x16xf32>, vector<8x16xf32> -> vector<8x16xf32>
    %c3_100 = arith.constant 3 : index
    %c0_101 = arith.constant 0 : index
    %c0_102 = arith.constant 0 : index
    %127 = vector.load %arg6[%c3_100, %c0_101, %c0_102] : memref<5x1x16xf32, #tpu.memory_space<vmem>>, vector<1x1x16xf32>
    %128 = vector.shape_cast %127 : vector<1x1x16xf32> to vector<1x16xf32>
    %129 = vector.broadcast %128 : vector<1x16xf32> to vector<8x16xf32>
    %130 = arith.addf %126, %129 : vector<8x16xf32>
    %c3_103 = arith.constant 3 : index
    %c0_104 = arith.constant 0 : index
    %c0_105 = arith.constant 0 : index
    %131 = vector.load %arg4[%c3_103, %c0_104, %c0_105] : memref<5x80x16xf32, #tpu.memory_space<vmem>>, vector<1x80x16xf32>
    %132 = vector.shape_cast %131 : vector<1x80x16xf32> to vector<80x16xf32>
    %cst_106 = arith.constant dense<0.000000e+00> : vector<8x16xf32>
    %133 = tpu.matmul %1, %132, %cst_106 {dimension_numbers = #tpu.dot_dimension_numbers<[1], [0], [0], [1], [0, 0, 1, 1], [], []>} : vector<8x80xf32>, vector<80x16xf32>, vector<8x16xf32> -> vector<8x16xf32>
    %c3_107 = arith.constant 3 : index
    %c0_108 = arith.constant 0 : index
    %c0_109 = arith.constant 0 : index
    %134 = vector.load %arg7[%c3_107, %c0_108, %c0_109] : memref<5x1x16xf32, #tpu.memory_space<vmem>>, vector<1x1x16xf32>
    %135 = vector.shape_cast %134 : vector<1x1x16xf32> to vector<1x16xf32>
    %136 = vector.broadcast %135 : vector<1x16xf32> to vector<8x16xf32>
    %137 = arith.addf %133, %136 : vector<8x16xf32>
    "tpu.trace_start"() <{level = 10 : i32, message = "qd,kd->qk"}> : () -> ()
    %cst_110 = arith.constant dense<0.000000e+00> : vector<8x8xf32>
    %138 = tpu.matmul %123, %130, %cst_110 {dimension_numbers = #tpu.dot_dimension_numbers<[1], [1], [0], [0], [0, 0, 1, 0], [], []>} : vector<8x16xf32>, vector<8x16xf32>, vector<8x8xf32> -> vector<8x8xf32>
    "tpu.trace_stop"() : () -> ()
    %cst_111 = arith.constant dense<0xFF800000> : vector<8xf32>
    %139 = vector.multi_reduction <maximumf>, %138, %cst_111 [1] : vector<8x8xf32> to vector<8xf32>
    %140 = vector.shape_cast %139 : vector<8xf32> to vector<8x1xf32>
    %141 = vector.broadcast %140 : vector<8x1xf32> to vector<8x8xf32>
    %142 = arith.subf %138, %141 : vector<8x8xf32>
    %143 = math.exp %142 : vector<8x8xf32>
    %cst_112 = arith.constant dense<0.000000e+00> : vector<8xf32>
    %144 = vector.multi_reduction <add>, %143, %cst_112 [1] : vector<8x8xf32> to vector<8xf32>
    %145 = vector.shape_cast %144 : vector<8xf32> to vector<8x1xf32>
    %146 = vector.broadcast %145 : vector<8x1xf32> to vector<8x8xf32>
    %147 = arith.divf %143, %146 : vector<8x8xf32>
    %cst_113 = arith.constant 0.111803398 : f32
    %148 = vector.broadcast %cst_113 : f32 to vector<8x8xf32>
    %149 = arith.mulf %147, %148 : vector<8x8xf32>
    %cst_114 = arith.constant dense<0.000000e+00> : vector<8x16xf32>
    %150 = tpu.matmul %149, %137, %cst_114 {dimension_numbers = #tpu.dot_dimension_numbers<[1], [0], [0], [1], [0, 0, 1, 1], [], []>} : vector<8x8xf32>, vector<8x16xf32>, vector<8x16xf32> -> vector<8x16xf32>
    %c3_115 = arith.constant 3 : index
    %c0_116 = arith.constant 0 : index
    %c0_117 = arith.constant 0 : index
    %151 = vector.load %arg8[%c3_115, %c0_116, %c0_117] : memref<5x16x80xf32, #tpu.memory_space<vmem>>, vector<1x16x80xf32>
    %152 = vector.shape_cast %151 : vector<1x16x80xf32> to vector<16x80xf32>
    %cst_118 = arith.constant dense<0.000000e+00> : vector<8x80xf32>
    %153 = tpu.matmul %150, %152, %cst_118 {dimension_numbers = #tpu.dot_dimension_numbers<[1], [0], [0], [1], [0, 0, 1, 1], [], []>} : vector<8x16xf32>, vector<16x80xf32>, vector<8x80xf32> -> vector<8x80xf32>
    %154 = arith.addf %116, %153 : vector<8x80xf32>
    %c4 = arith.constant 4 : index
    %c0_119 = arith.constant 0 : index
    %c0_120 = arith.constant 0 : index
    %155 = vector.load %arg2[%c4, %c0_119, %c0_120] : memref<5x80x16xf32, #tpu.memory_space<vmem>>, vector<1x80x16xf32>
    %156 = vector.shape_cast %155 : vector<1x80x16xf32> to vector<80x16xf32>
    %cst_121 = arith.constant dense<0.000000e+00> : vector<8x16xf32>
    %157 = tpu.matmul %1, %156, %cst_121 {dimension_numbers = #tpu.dot_dimension_numbers<[1], [0], [0], [1], [0, 0, 1, 1], [], []>} : vector<8x80xf32>, vector<80x16xf32>, vector<8x16xf32> -> vector<8x16xf32>
    %c4_122 = arith.constant 4 : index
    %c0_123 = arith.constant 0 : index
    %c0_124 = arith.constant 0 : index
    %158 = vector.load %arg5[%c4_122, %c0_123, %c0_124] : memref<5x1x16xf32, #tpu.memory_space<vmem>>, vector<1x1x16xf32>
    %159 = vector.shape_cast %158 : vector<1x1x16xf32> to vector<1x16xf32>
    %160 = vector.broadcast %159 : vector<1x16xf32> to vector<8x16xf32>
    %161 = arith.addf %157, %160 : vector<8x16xf32>
    %c4_125 = arith.constant 4 : index
    %c0_126 = arith.constant 0 : index
    %c0_127 = arith.constant 0 : index
    %162 = vector.load %arg3[%c4_125, %c0_126, %c0_127] : memref<5x80x16xf32, #tpu.memory_space<vmem>>, vector<1x80x16xf32>
    %163 = vector.shape_cast %162 : vector<1x80x16xf32> to vector<80x16xf32>
    %cst_128 = arith.constant dense<0.000000e+00> : vector<8x16xf32>
    %164 = tpu.matmul %1, %163, %cst_128 {dimension_numbers = #tpu.dot_dimension_numbers<[1], [0], [0], [1], [0, 0, 1, 1], [], []>} : vector<8x80xf32>, vector<80x16xf32>, vector<8x16xf32> -> vector<8x16xf32>
    %c4_129 = arith.constant 4 : index
    %c0_130 = arith.constant 0 : index
    %c0_131 = arith.constant 0 : index
    %165 = vector.load %arg6[%c4_129, %c0_130, %c0_131] : memref<5x1x16xf32, #tpu.memory_space<vmem>>, vector<1x1x16xf32>
    %166 = vector.shape_cast %165 : vector<1x1x16xf32> to vector<1x16xf32>
    %167 = vector.broadcast %166 : vector<1x16xf32> to vector<8x16xf32>
    %168 = arith.addf %164, %167 : vector<8x16xf32>
    %c4_132 = arith.constant 4 : index
    %c0_133 = arith.constant 0 : index
    %c0_134 = arith.constant 0 : index
    %169 = vector.load %arg4[%c4_132, %c0_133, %c0_134] : memref<5x80x16xf32, #tpu.memory_space<vmem>>, vector<1x80x16xf32>
    %170 = vector.shape_cast %169 : vector<1x80x16xf32> to vector<80x16xf32>
    %cst_135 = arith.constant dense<0.000000e+00> : vector<8x16xf32>
    %171 = tpu.matmul %1, %170, %cst_135 {dimension_numbers = #tpu.dot_dimension_numbers<[1], [0], [0], [1], [0, 0, 1, 1], [], []>} : vector<8x80xf32>, vector<80x16xf32>, vector<8x16xf32> -> vector<8x16xf32>
    %c4_136 = arith.constant 4 : index
    %c0_137 = arith.constant 0 : index
    %c0_138 = arith.constant 0 : index
    %172 = vector.load %arg7[%c4_136, %c0_137, %c0_138] : memref<5x1x16xf32, #tpu.memory_space<vmem>>, vector<1x1x16xf32>
    %173 = vector.shape_cast %172 : vector<1x1x16xf32> to vector<1x16xf32>
    %174 = vector.broadcast %173 : vector<1x16xf32> to vector<8x16xf32>
    %175 = arith.addf %171, %174 : vector<8x16xf32>
    "tpu.trace_start"() <{level = 10 : i32, message = "qd,kd->qk"}> : () -> ()
    %cst_139 = arith.constant dense<0.000000e+00> : vector<8x8xf32>
    %176 = tpu.matmul %161, %168, %cst_139 {dimension_numbers = #tpu.dot_dimension_numbers<[1], [1], [0], [0], [0, 0, 1, 0], [], []>} : vector<8x16xf32>, vector<8x16xf32>, vector<8x8xf32> -> vector<8x8xf32>
    "tpu.trace_stop"() : () -> ()
    %cst_140 = arith.constant dense<0xFF800000> : vector<8xf32>
    %177 = vector.multi_reduction <maximumf>, %176, %cst_140 [1] : vector<8x8xf32> to vector<8xf32>
    %178 = vector.shape_cast %177 : vector<8xf32> to vector<8x1xf32>
    %179 = vector.broadcast %178 : vector<8x1xf32> to vector<8x8xf32>
    %180 = arith.subf %176, %179 : vector<8x8xf32>
    %181 = math.exp %180 : vector<8x8xf32>
    %cst_141 = arith.constant dense<0.000000e+00> : vector<8xf32>
    %182 = vector.multi_reduction <add>, %181, %cst_141 [1] : vector<8x8xf32> to vector<8xf32>
    %183 = vector.shape_cast %182 : vector<8xf32> to vector<8x1xf32>
    %184 = vector.broadcast %183 : vector<8x1xf32> to vector<8x8xf32>
    %185 = arith.divf %181, %184 : vector<8x8xf32>
    %cst_142 = arith.constant 0.111803398 : f32
    %186 = vector.broadcast %cst_142 : f32 to vector<8x8xf32>
    %187 = arith.mulf %185, %186 : vector<8x8xf32>
    %cst_143 = arith.constant dense<0.000000e+00> : vector<8x16xf32>
    %188 = tpu.matmul %187, %175, %cst_143 {dimension_numbers = #tpu.dot_dimension_numbers<[1], [0], [0], [1], [0, 0, 1, 1], [], []>} : vector<8x8xf32>, vector<8x16xf32>, vector<8x16xf32> -> vector<8x16xf32>
    %c4_144 = arith.constant 4 : index
    %c0_145 = arith.constant 0 : index
    %c0_146 = arith.constant 0 : index
    %189 = vector.load %arg8[%c4_144, %c0_145, %c0_146] : memref<5x16x80xf32, #tpu.memory_space<vmem>>, vector<1x16x80xf32>
    %190 = vector.shape_cast %189 : vector<1x16x80xf32> to vector<16x80xf32>
    %cst_147 = arith.constant dense<0.000000e+00> : vector<8x80xf32>
    %191 = tpu.matmul %188, %190, %cst_147 {dimension_numbers = #tpu.dot_dimension_numbers<[1], [0], [0], [1], [0, 0, 1, 1], [], []>} : vector<8x16xf32>, vector<16x80xf32>, vector<8x80xf32> -> vector<8x80xf32>
    %192 = arith.addf %154, %191 : vector<8x80xf32>
    %c0_148 = arith.constant 0 : index
    %c0_149 = arith.constant 0 : index
    %193 = vector.load %arg9[%c0_148, %c0_149] : memref<1x80xf32, #tpu.memory_space<vmem>>, vector<1x80xf32>
    %194 = vector.broadcast %193 : vector<1x80xf32> to vector<8x80xf32>
    %195 = arith.addf %192, %194 : vector<8x80xf32>
    %c0_150 = arith.constant 0 : index
    %c0_151 = arith.constant 0 : index
    %c0_152 = arith.constant 0 : index
    %196 = vector.load %arg10[%c0_150, %c0_151, %c0_152] : memref<1x8x80xf32, #tpu.memory_space<vmem>>, vector<1x8x80xf32>
    %197 = vector.shape_cast %196 : vector<1x8x80xf32> to vector<8x80xf32>
    %198 = vector.shape_cast %195 : vector<8x80xf32> to vector<1x8x80xf32>
    tpu.vector_store %arg10[%c0_150, %c0_151, %c0_152], %198 {strides = array<i32>} : memref<1x8x80xf32, #tpu.memory_space<vmem>>, vector<1x8x80xf32>,
    return
  }
  func.func @transform_0(%arg0: i32) -> (i32, i32, i32) {
    %c0_i32 = arith.constant 0 : i32
    %c0_i32_0 = arith.constant 0 : i32
    %c0_i32_1 = arith.constant 0 : i32
    return %arg0, %c0_i32, %c0_i32_0 : i32, i32, i32
  }
  func.func @transform_1(%arg0: i32) -> (i32, i32, i32) {
    %c0_i32 = arith.constant 0 : i32
    %c0_i32_0 = arith.constant 0 : i32
    %c0_i32_1 = arith.constant 0 : i32
    %c0_i32_2 = arith.constant 0 : i32
    return %c0_i32, %c0_i32_0, %c0_i32_1 : i32, i32, i32
  }
  func.func @transform_2(%arg0: i32) -> (i32, i32, i32) {
    %c0_i32 = arith.constant 0 : i32
    %c0_i32_0 = arith.constant 0 : i32
    %c0_i32_1 = arith.constant 0 : i32
    %c0_i32_2 = arith.constant 0 : i32
    return %c0_i32, %c0_i32_0, %c0_i32_1 : i32, i32, i32
  }
  func.func @transform_3(%arg0: i32) -> (i32, i32, i32) {
    %c0_i32 = arith.constant 0 : i32
    %c0_i32_0 = arith.constant 0 : i32
    %c0_i32_1 = arith.constant 0 : i32
    %c0_i32_2 = arith.constant 0 : i32
    return %c0_i32, %c0_i32_0, %c0_i32_1 : i32, i32, i32
  }
  func.func @transform_4(%arg0: i32) -> (i32, i32, i32) {
    %c0_i32 = arith.constant 0 : i32
    %c0_i32_0 = arith.constant 0 : i32
    %c0_i32_1 = arith.constant 0 : i32
    %c0_i32_2 = arith.constant 0 : i32
    return %c0_i32, %c0_i32_0, %c0_i32_1 : i32, i32, i32
  }
  func.func @transform_5(%arg0: i32) -> (i32, i32, i32) {
    %c0_i32 = arith.constant 0 : i32
    %c0_i32_0 = arith.constant 0 : i32
    %c0_i32_1 = arith.constant 0 : i32
    %c0_i32_2 = arith.constant 0 : i32
    return %c0_i32, %c0_i32_0, %c0_i32_1 : i32, i32, i32
  }
  func.func @transform_6(%arg0: i32) -> (i32, i32, i32) {
    %c0_i32 = arith.constant 0 : i32
    %c0_i32_0 = arith.constant 0 : i32
    %c0_i32_1 = arith.constant 0 : i32
    %c0_i32_2 = arith.constant 0 : i32
    return %c0_i32, %c0_i32_0, %c0_i32_1 : i32, i32, i32
  }
  func.func @transform_7(%arg0: i32) -> (i32, i32, i32) {
    %c0_i32 = arith.constant 0 : i32
    %c0_i32_0 = arith.constant 0 : i32
    %c0_i32_1 = arith.constant 0 : i32
    %c0_i32_2 = arith.constant 0 : i32
    return %c0_i32, %c0_i32_0, %c0_i32_1 : i32, i32, i32
  }
  func.func @transform_8(%arg0: i32) -> (i32, i32) {
    %c0_i32 = arith.constant 0 : i32
    %c0_i32_0 = arith.constant 0 : i32
    %c0_i32_1 = arith.constant 0 : i32
    return %c0_i32, %c0_i32_0 : i32, i32
  }
  func.func @transform_9(%arg0: i32) -> (i32, i32, i32) {
    %c0_i32 = arith.constant 0 : i32
    %c0_i32_0 = arith.constant 0 : i32
    %c0_i32_1 = arith.constant 0 : i32
    return %arg0, %c0_i32, %c0_i32_0 : i32, i32, i32
  }
}

</mosaic_0001>

<bundles_post_ra>
// kernel: mha_forward.1
= control target key start
LH: loop header
LB: loop body
LE: loop exit
PB: predicated region body
PF: predicated region fallthrough
CT: control target
= control target key end

     0   :  { %14 = vsyncpa [#allocation3], 0  ;;  %s2533_s0 = inlined_call_operand.vmem [shape: f32[2,8,80], index: 0, kind: input, shape index: {}]   ;;  %s2534_s1 = inlined_call_operand.vmem [shape: f32[5,80,16], index: 1, kind: input, shape index: {}]   ;;  %s2535_s2 = inlined_call_operand.vmem [shape: f32[5,80,16], index: 2, kind: input, shape index: {}]   ;;  %s2536_s3 = inlined_call_operand.vmem [shape: f32[5,80,16], index: 3, kind: input, shape index: {}]   ;;  %s2537_s4 = inlined_call_operand.vmem [shape: f32[5,1,16], index: 4, kind: input, shape index: {}]   ;;  %s2538_s5 = inlined_call_operand.vmem [shape: f32[5,1,16], index: 5, kind: input, shape index: {}]   ;;  %s2539_s6 = inlined_call_operand.vmem [shape: f32[5,1,16], index: 6, kind: input, shape index: {}]   ;;  %s2540_s7 = inlined_call_operand.vmem [shape: f32[5,16,80], index: 7, kind: input, shape index: {}]   ;;  %s2541_s8 = inlined_call_operand.vmem [shape: f32[1,80], index: 8, kind: input, shape index: {}]   ;;  %s2542_s9 = inlined_call_operand.hbm [shape: f32[2,8,80], index: 9, kind: output, shape index: {}]  }
   0x1   :  { %16 = vsyncpa [#allocation3 + $0x1], 0  ;;  %s1826_s30 = smov 0   ;;  %s1828_s10 = smov 0  }
   0x2   :  { %s1830_s11 = smov 0   ;;  %s1832_s12 = smov 0  }
   0x3 LB: > { %s1847_s13 = sadd.s32 4294967295, %s1774_s12   ;;  %s1452_s14 = sadd.s32 4294967294, %s1774_s12   ;;  %s1774_s12 = sphi %s1832_s12, %s2548_s12   ;;  %s1770_s11 = sphi %s1830_s11, %s2547_s11   ;;  %s1766_s10 = sphi %s1828_s10, %s2546_s10   ;;  %s1762_s30 = sphi %s1826_s30, %s2545_s30  }
   0x4   : > { %s1851_s15 = sadd.s32 1, %s1774_s12   ;;  %s223_s16 = sadd.s32 1, %s1770_s11 }
   0x5   : > { %s220_s17 = ssub.s32 %s1774_s12, %s1851_s15  ;;  %p233_p0 = scmp.ne.s32.totalorder %s1770_s11, %s1766_s10 }
   0x6   : > { %p221_p1 = scmp.eq.s32.totalorder %s220_s17, 0  ;;  %p234_p2 = scmp.eq.s32.totalorder %s1847_s13, 1 }
   0x7   : > { %p239_p3 = scmp.ne.s32.totalorder %s1766_s10, %s1762_s30  ;;  %p240_p4 = scmp.eq.s32.totalorder %s1452_s14, 1 }
   0x8   : > { %s1862_s18 = scalar_select %p221_p1, %s1770_s11, %s223_s16  }
   0x9   : > { %p1864_p5 = por %p234_p2, %p233_p0  ;;  %p1868_p6 = por %p240_p4, %p239_p3 }
   0xa   : > { %p1455_p7 = scmp.ge.s32.totalorder %s1774_s12, 1  ;;  %p289_p8 = scmp.lt.s32.totalorder %s1774_s12, 3 }
   0xc   : > { %p290_p9 = pnand %p1455_p7, %p289_p8 }
   0xd   : > { %p324_p10 = scmp.lt.s32.totalorder (!%p290_p9), %s1847_s13, 1  ;;  %s321_s14 = sand.u32 (!%p290_p9), 1, %s1766_s10  }
   0xe   : > { %293 = sbr.rel (%p290_p9) target bundleno = 2850 (0xb22), region = 56  ;;  %s1456_s16 = sshll.u32 (!%p290_p9), %s321_s14, 3 }
   0xf   : > { %s323_s26 = scalar_lea.vmem (!%p290_p9), [#allocation2], %s1456_s16  ;;  %s1732_s16 = scalar_lea.hbm (!%p290_p9), %s2542_s9, 16 }
  0x13   : > { %v376_v0 = vld [vmem:[%s2535_s2 + $0x48] sm:$0xff]  ;;  %v375_v1 = vld [vmem:[%s2535_s2 + $0x40] sm:$0xff]  ;;  %v374_v4 = vld [vmem:[%s2535_s2 + $0x38] sm:$0xff]  ;;  %s325_s21 = scalar_select %p324_p10, %s1847_s13, 1  ;;  %vm343_vm0 = vcmask 654336   ;;  %vm435_vm1 = vcmask 130048  }
  0x14   : > { %v338_v2 = vld [vmem:[%s2534_s1 + $0x48] sm:$0xff]  ;;  %387 = vmatpush.msra.mxu1 %v376_v0  ;;  %v337_v3 = vld [vmem:[%s2534_s1 + $0x40] sm:$0xff]  ;;  %v336_v5 = vld [vmem:[%s2534_s1 + $0x38] sm:$0xff]  ;;  %vm462_vm2 = vcmask 64512  }
  0x15   : > { %353 = vmatpush.msra.mxu0 %v338_v2  ;;  %v373_v6 = vld [vmem:[%s2535_s2 + $0x30] sm:$0xff]  ;;  %v372_v8 = vld [vmem:[%s2535_s2 + $0x28] sm:$0xff]  ;;  %v371_v9 = vld [vmem:[%s2535_s2 + $0x20] sm:$0xff]  ;;  %s1457_s23 = sshll.u32 %s325_s21, 3 }
  0x16   : > { %388 = vmatpush.msra.mxu1 %v375_v1  ;;  %v335_v7 = vld [vmem:[%s2534_s1 + $0x30] sm:$0xff]  ;;  %v334_v10 = vld [vmem:[%s2534_s1 + $0x28] sm:$0xff]  ;;  %v333_v11 = vld [vmem:[%s2534_s1 + $0x20] sm:$0xff]  ;;  %s327_s27 = scalar_lea.vmem %s2533_s0, %s1457_s23  ;;  %s1634_s23 = sshll.u32 %s1847_s13, 3 }
  0x17   : > { %354 = vmatpush.msra.mxu0 %v337_v3  ;;  %v370_v12 = vld [vmem:[%s2535_s2 + $0x18] sm:$0xff]  ;;  %v369_v14 = vld [vmem:[%s2535_s2 + $0x10] sm:$0xff]  ;;  %v368_v16 = vld [vmem:[%s2535_s2 + $0x8] sm:$0xff]  ;;  %s1388_s22 = scalar_lea.hbm %s2542_s9, %s1634_s23  ;;  %s1378_s13 = scalar_lea.sflag [#allocation3], %s321_s14 }
  0x18   : > { %389 = vmatpush.msra.mxu1 %v374_v4  ;;  %v332_v13 = vld [vmem:[%s2534_s1 + $0x18] sm:$0xff]  ;;  %v331_v15 = vld [vmem:[%s2534_s1 + $0x10] sm:$0xff]  ;;  %v330_v17 = vld [vmem:[%s2534_s1 + $0x8] sm:$0xff]  ;;  %s1392_s28 = sshll.u32 %s1388_s22, 4  ;;  %s1393_s28 = int_to_ptr.hbm [resolvable:$true] %s1392_s28 }
  0x19   : > { %355 = vmatpush.msra.mxu0 %v336_v5  ;;  %v367_v18 = vld [vmem:[%s2535_s2] sm:$0xff]  ;;  %v410_v27 = vld [vmem:[%s2536_s3 + $0x48] sm:$0xff]  ;;  %v408_v29 = vld [vmem:[%s2536_s3 + $0x38] sm:$0xff]  ;;  %s1726_s29 = sshra.s32 %s1393_s28, 4  ;;  %s1727_s29 = int_to_ptr.hbm [resolvable:$true] %s1726_s29 }
  0x1a   : > { %390 = vmatpush.msra.mxu1 %v373_v6  ;;  %v329_v19 = vld [vmem:[%s2534_s1] sm:$0xff]  ;;  %421 = vmatpush.msra.mxu2 %v410_v27  ;;  %v407_v30 = vld [vmem:[%s2536_s3 + $0x30] sm:$0xff]  ;;  %v406_v31 = vld [vmem:[%s2536_s3 + $0x28] sm:$0xff]  ;;  %s1728_s23 = scalar_lea.hbm %s1727_s29, 8  ;;  %p1733_p0 = scmp.lt.s32.totalorder %s1727_s29, %s2542_s9 }
  0x1b   : > { %356 = vmatpush.msra.mxu0 %v335_v7  ;;  %v1939_v20 = vld [vmem:[%s327_s27] sm:$0xff]  ;;  %v404_v33 = vld [vmem:[%s2536_s3 + $0x18] sm:$0xff]  ;;  %v403_v34 = vld [vmem:[%s2536_s3 + $0x10] sm:$0xff]  ;;  %s1390_s27 = sshll.u32 %s323_s26, 4  ;;  %p1729_p11 = scmp.ne.s32.totalorder %s1727_s29, %s1728_s23  ;;  %s1391_s27 = int_to_ptr.vmem [resolvable:$true] %s1390_s27 }
  0x1c   : > { %391 = vmatpush.msra.mxu1 %v372_v8  ;;  %v1676_v21 = vld [vmem:[%s2538_s5] ss:$0 sm:$0xff]  ;;  %v402_v37 = vld [vmem:[%s2536_s3 + $0x8] sm:$0xff]  ;;  %v1473_v47 = vld [vmem:[%s2534_s1 + $0x98] sm:$0xff]  ;;  %p1734_p1 = scmp.lt.s32.totalorder %s1732_s16, %s1728_s23 }
  0x1d   : > { %357 = vmatpush.msra.mxu0 %v334_v10  ;;  %v1677_v22 = vld [vmem:[%s2537_s4] ss:$0 sm:$0xff]  ;;  %v1472_v48 = vld [vmem:[%s2534_s1 + $0x90] sm:$0xff]  ;;  %v1485_v49 = vld [vmem:[%s2535_s2 + $0x98] sm:$0xff]  ;;  %p1730_p12 = pnand %p1729_p11, %p1864_p5 }
  0x1e   : > { %392 = vmatpush.msra.mxu1 %v371_v9  ;;  %v409_v28 = vld [vmem:[%s2536_s3 + $0x40] sm:$0xff]  ;;  %v1471_v50 = vld [vmem:[%s2534_s1 + $0x88] sm:$0xff]  ;;  %v1484_v51 = vld [vmem:[%s2535_s2 + $0x90] sm:$0xff]  ;;  %p1735_p2 = por %p1734_p1, %p1733_p0 }
  0x1f   : > { %358 = vmatpush.msra.mxu0 %v333_v11  ;;  %422 = vmatpush.msra.mxu2 %v409_v28  ;;  %v405_v32 = vld [vmem:[%s2536_s3 + $0x20] sm:$0xff]  ;;  %v1483_v53 = vld [vmem:[%s2535_s2 + $0x88] sm:$0xff]  ;;  %v1469_v54 = vld [vmem:[%s2534_s1 + $0x78] sm:$0xff]  ;;  %p1731_p13 = pneg %p1730_p12 }
  0x20   : > { %393 = vmatpush.msra.mxu1 %v370_v12  ;;  %v401_v38 = vld [vmem:[%s2536_s3] sm:$0xff]  ;;  %v1468_v56 = vld [vmem:[%s2534_s1 + $0x70] sm:$0xff]  ;;  %v1481_v57 = vld [vmem:[%s2535_s2 + $0x78] sm:$0xff] }
  0x21   : > { %359 = vmatpush.msra.mxu0 %v332_v13  ;;  %423 = vmatpush.msra.mxu2 %v408_v29  ;;  %v1678_v44 = vld [vmem:[%s2539_s6] ss:$0 sm:$0xff]  ;;  %v1467_v58 = vld [vmem:[%s2534_s1 + $0x68] sm:$0xff]  ;;  %v1480_v59 = vld [vmem:[%s2535_s2 + $0x70] sm:$0xff]  ;;  %p1736_p3 = pnand %p1735_p2, %p1731_p13 }
  0x22   : > { %394 = vmatpush.msra.mxu1 %v369_v14  ;;  %v1470_v52 = vld [vmem:[%s2534_s1 + $0x80] sm:$0xff]  ;;  %v1479_v61 = vld [vmem:[%s2535_s2 + $0x68] sm:$0xff]  ;;  %v1465_v62 = vld [vmem:[%s2534_s1 + $0x58] sm:$0xff] }
  0x23   : > { %360 = vmatpush.msra.mxu0 %v331_v15  ;;  %424 = vmatpush.msra.mxu2 %v407_v30  ;;  %v1482_v55 = vld [vmem:[%s2535_s2 + $0x80] sm:$0xff]  ;;  %v1464_v0 = vld [vmem:[%s2534_s1 + $0x50] sm:$0xff]  ;;  %v1477_v1 = vld [vmem:[%s2535_s2 + $0x58] sm:$0xff] }
  0x24   : > { %395 = vmatpush.msra.mxu1 %v368_v16  ;;  %v1466_v60 = vld [vmem:[%s2534_s1 + $0x60] sm:$0xff]  ;;  %v1476_v2 = vld [vmem:[%s2535_s2 + $0x50] sm:$0xff]  ;;  %v1495_v28 = vld [vmem:[%s2536_s3 + $0x88] sm:$0xff] }
  0x25   : > { %361 = vmatpush.msra.mxu0 %v330_v17  ;;  %425 = vmatpush.msra.mxu2 %v406_v31  ;;  %v1478_v63 = vld [vmem:[%s2535_s2 + $0x60] sm:$0xff]  ;;  %v1493_v30 = vld [vmem:[%s2536_s3 + $0x78] sm:$0xff]  ;;  %v1492_v31 = vld [vmem:[%s2536_s3 + $0x70] sm:$0xff] }
  0x26   : > { %396 = vmatpush.msra.mxu1 %v367_v18  ;;  %v1679_v16 = vld [vmem:[%s2538_s5 + $0x1] ss:$0 sm:$0xff] }
  0x27   : > { %362 = vmatpush.msra.mxu0 %v329_v19  ;;  %1459 = vmatmul.msk.f32.vlgmr.msra.gmra.mxu1 %vm343_vm0, %v1939_v20  ;;  %v1494_v29 = vld [vmem:[%s2536_s3 + $0x80] sm:$0xff] }
  0x28   : > { %1458 = vmatmul.msk.f32.vlgmr.msra.gmra.mxu0 %vm343_vm0, %v1939_v20  ;;  %426 = vmatpush.msra.mxu2 %v405_v32  ;;  %v1491_v32 = vld [vmem:[%s2536_s3 + $0x68] sm:$0xff] }
  0x29   : > { %571 = vmatpush.msrb.mxu0 %v1485_v49  ;;  %v1522_v49 = vld [vmem:[%s2535_s2 + $0xb8] sm:$0xff] }
  0x2a   : > { %427 = vmatpush.msra.mxu2 %v404_v33  ;;  %v1490_v33 = vld [vmem:[%s2536_s3 + $0x60] sm:$0xff] }
  0x2b   : > { %572 = vmatpush.msrb.mxu0 %v1484_v51  ;;  %v1521_v51 = vld [vmem:[%s2535_s2 + $0xb0] sm:$0xff] }
  0x2c   : > { %428 = vmatpush.msra.mxu2 %v403_v34  ;;  %v1489_v34 = vld [vmem:[%s2536_s3 + $0x58] sm:$0xff] }
  0x2d   : > { %573 = vmatpush.msrb.mxu0 %v1483_v53  ;;  %v1520_v53 = vld [vmem:[%s2535_s2 + $0xa8] sm:$0xff] }
  0x2e   : > { %429 = vmatpush.msra.mxu2 %v402_v37  ;;  %v1516_v37 = vld [vmem:[%s2534_s1 + $0xe8] sm:$0xff] }
  0x2f   : > { %574 = vmatpush.msrb.mxu0 %v1482_v55  ;;  %v1519_v55 = vld [vmem:[%s2535_s2 + $0xa0] sm:$0xff] }
  0x30   : > { %430 = vmatpush.msra.mxu2 %v401_v38  ;;  %v1515_v38 = vld [vmem:[%s2534_s1 + $0xe0] sm:$0xff] }
  0x31   : > { %1460 = vmatmul.msk.f32.vlgmr.msra.gmra.mxu2 %vm343_vm0, %v1939_v20  ;;  %575 = vmatpush.msrb.mxu0 %v1481_v57 }
  0x33   : > { %576 = vmatpush.msrb.mxu0 %v1480_v59 }
  0x35   : > { %577 = vmatpush.msrb.mxu0 %v1479_v61  ;;  %v1681_v61 = vld [vmem:[%s2539_s6 + $0x1] ss:$0 sm:$0xff] }
  0x37   : > { %578 = vmatpush.msrb.mxu0 %v1478_v63 }
  0x39   : > { %579 = vmatpush.msrb.mxu0 %v1477_v1  ;;  %v511_v1 = vld [vmem:[%s2540_s7] sm:$0xff] }
  0x3b   : > { %580 = vmatpush.msrb.mxu0 %v1476_v2 }
  0x3c   : > { %1487 = vmatmul.msk.f32.vlgmr.msrb.gmra.mxu0 %vm343_vm0, %v1939_v20 }
  0x3d   : > { %766 = vmatpush.msra.mxu0 %v1516_v37  ;;  %v1531_v37 = vld [vmem:[%s2536_s3 + $0xa0] sm:$0xff] }
  0x3f   : > { %767 = vmatpush.msra.mxu0 %v1515_v38 }
  0xa4   : > { %v398_v23 = vpop.f32.mrf.mxu1 }
  0xa5   : > { %v364_v24 = vpop.f32.mrf.mxu0  ;;  %v399_v25 = vadd.f32 %v1676_v21, %v398_v23  ;;  %v1680_v21 = vld [vmem:[%s2537_s4 + $0x1] ss:$0 sm:$0xff] }
  0xa6   : > { %v365_v26 = vadd.f32 %v1677_v22, %v364_v24  ;;  %v1497_v24 = vld [vmem:[%s2536_s3 + $0x98] sm:$0xff] }
  0xa7   : > { %1461 = vmatpush.xpose.msk.msra.mxu3 %vm435_vm1, %v399_v25  ;;  %v1496_v25 = vld [vmem:[%s2536_s3 + $0x90] sm:$0xff]  ;;  %607 = vmatpush.msrb.mxu1 %v1497_v24 }
  0xa8   : > { %v1503_v24 = vld [vmem:[%s2540_s7 + $0x10] sm:$0xff] }
  0xa9   : > { %608 = vmatpush.msrb.mxu1 %v1496_v25  ;;  %v1540_v25 = vld [vmem:[%s2536_s3 + $0xe8] sm:$0xff] }
  0xaa   : > { %1462 = vmatmul.msk.f32.vlgmr.msra.gmra.mxu3 %vm435_vm1, %v365_v26 }
  0xab   : > { %609 = vmatpush.msrb.mxu1 %v1495_v28  ;;  %v1536_v28 = vld [vmem:[%s2536_s3 + $0xc8] sm:$0xff] }
  0xad   : > { %610 = vmatpush.msrb.mxu1 %v1494_v29  ;;  %v1535_v29 = vld [vmem:[%s2536_s3 + $0xc0] sm:$0xff] }
  0xaf   : > { %611 = vmatpush.msrb.mxu1 %v1493_v30  ;;  %v1534_v30 = vld [vmem:[%s2536_s3 + $0xb8] sm:$0xff] }
  0xb1   : > { %612 = vmatpush.msrb.mxu1 %v1492_v31 }
  0xb3   : > { %613 = vmatpush.msrb.mxu1 %v1491_v32 }
  0xb4   : > { %v432_v45 = vpop.f32.mrf.mxu2 }
  0xb5   : > { %v433_v46 = vadd.f32 %v1678_v44, %v432_v45  ;;  %614 = vmatpush.msrb.mxu1 %v1490_v33  ;;  %v1512_v44 = vld [vmem:[%s2534_s1 + $0xc8] sm:$0xff] }
  0xb6   : > { %v1524_v45 = vld [vmem:[%s2535_s2 + $0xc8] sm:$0xff] }
  0xb7   : > { %506 = vmatpush.msrb.mxu3 %v433_v46  ;;  %615 = vmatpush.msrb.mxu1 %v1489_v34  ;;  %v1511_v46 = vld [vmem:[%s2534_s1 + $0xc0] sm:$0xff] }
  0xb9   : > { %535 = vmatpush.msra.mxu3 %v1473_v47  ;;  %v582_v17 = vpop.f32.mrf.mxu0  ;;  %v1523_v47 = vld [vmem:[%s2535_s2 + $0xc0] sm:$0xff] }
  0xba   : > { %v583_v18 = vadd.f32 %v1679_v16, %v582_v17 }
  0xbb   : > { %536 = vmatpush.msra.mxu3 %v1472_v48  ;;  %v1510_v48 = vld [vmem:[%s2534_s1 + $0xb8] sm:$0xff] }
  0xbc   : > { %1500 = vmatpush.xpose.msk.msrb.mxu2 %vm435_vm1, %v583_v18 }
  0xbd   : > { %537 = vmatpush.msra.mxu3 %v1471_v50  ;;  %v1509_v50 = vld [vmem:[%s2534_s1 + $0xb0] sm:$0xff] }
  0xbf   : > { %538 = vmatpush.msra.mxu3 %v1470_v52  ;;  %v1508_v52 = vld [vmem:[%s2534_s1 + $0xa8] sm:$0xff] }
  0xc1   : > { %539 = vmatpush.msra.mxu3 %v1469_v54  ;;  %v1507_v54 = vld [vmem:[%s2534_s1 + $0xa0] sm:$0xff] }
  0xc3   : > { %540 = vmatpush.msra.mxu3 %v1468_v56 }
  0xc5   : > { %541 = vmatpush.msra.mxu3 %v1467_v58 }
  0xc7   : > { %542 = vmatpush.msra.mxu3 %v1466_v60 }
  0xc9   : > { %543 = vmatpush.msra.mxu3 %v1465_v62 }
  0xcb   : > { %544 = vmatpush.msra.mxu3 %v1464_v0  ;;  %v512_v0 = vld [vmem:[%s2540_s7 + $0x8] sm:$0xff] }
 0x12d   : > { %v459_v35 = vpop.f32.mrf.mxu3 }
 0x12e   : > { %v463_v36 = vsel %vm462_vm2, %v459_v35, -inf }
 0x12f   : > { %464 = vmax.xlane.f32.xlu0 %v463_v36  ;;  %v1528_v36 = vld [vmem:[%s2535_s2 + $0xe8] sm:$0xff] }
 0x1a2   : > { %v465_v39 = vpop.xlane.xlu0 %464 }
 0x1a3   : > { %v466_v40 = vsub.f32 %v459_v35, %v465_v39  ;;  %v1488_v35 = vld [vmem:[%s2536_s3 + $0x50] sm:$0xff]  ;;  %v1527_v39 = vld [vmem:[%s2535_s2 + $0xe0] sm:$0xff] }
 0x1a4   : > { %616 = vmatpush.msrb.mxu1 %v1488_v35  ;;  %v1533_v35 = vld [vmem:[%s2536_s3 + $0xb0] sm:$0xff] }
 0x1a5   : > { %v467_v41 = vmul.f32 1.442695, %v466_v40  ;;  %v1514_v40 = vld [vmem:[%s2534_s1 + $0xd8] sm:$0xff]  ;;  %1499 = vmatmul.msk.f32.vlgmr.msrb.gmra.mxu1 %vm343_vm0, %v1939_v20 }
 0x1a6   : > { %802 = vmatpush.msra.mxu1 %v1528_v36  ;;  %768 = vmatpush.msra.mxu0 %v1514_v40  ;;  %v1532_v36 = vld [vmem:[%s2536_s3 + $0xa8] sm:$0xff] }
 0x1a7   : > { %1692 = vpow2.f32 %v467_v41  ;;  %v1526_v41 = vld [vmem:[%s2535_s2 + $0xd8] sm:$0xff] }
 0x1a8   : > { %803 = vmatpush.msra.mxu1 %v1527_v39 }
 0x1aa   : > { %804 = vmatpush.msra.mxu1 %v1526_v41 }
 0x1ad   : > { %v1986_v42 = vpop.eup %1692 }
 0x1ae   : > { %v469_v43 = vsel %vm462_vm2, %v1986_v42, 0.0 }
 0x1af   : > { %470 = vadd.xlane.f32.xlu0 %v469_v43  ;;  %v1525_v43 = vld [vmem:[%s2535_s2 + $0xd0] sm:$0xff] }
 0x1b0   : > { %805 = vmatpush.msra.mxu1 %v1525_v43 }
 0x1b2   : > { %806 = vmatpush.msra.mxu1 %v1524_v45 }
 0x1b4   : > { %807 = vmatpush.msra.mxu1 %v1523_v47  ;;  %v1570_v47 = vld [vmem:[%s2535_s2 + $0x138] sm:$0xff] }
 0x1b6   : > { %808 = vmatpush.msra.mxu1 %v1522_v49  ;;  %v1568_v49 = vld [vmem:[%s2535_s2 + $0x128] sm:$0xff] }
 0x1b8   : > { %809 = vmatpush.msra.mxu1 %v1521_v51  ;;  %v1566_v51 = vld [vmem:[%s2535_s2 + $0x118] sm:$0xff] }
 0x1ba   : > { %810 = vmatpush.msra.mxu1 %v1520_v53  ;;  %v1565_v53 = vld [vmem:[%s2535_s2 + $0x110] sm:$0xff] }
 0x1bc   : > { %811 = vmatpush.msra.mxu1 %v1519_v55  ;;  %v1564_v55 = vld [vmem:[%s2535_s2 + $0x108] sm:$0xff] }
 0x1bd   : > { %1530 = vmatmul.msk.f32.vlgmr.msra.gmra.mxu1 %vm343_vm0, %v1939_v20 }
 0x222   : > { %v471_v3 = vpop.xlane.xlu0 %470  ;;  %v618_v62 = vpop.f32.mrf.mxu1 }
 0x223   : > { %1694 = vrcp.f32 %v471_v3  ;;  %v483_v7 = vand.u32 2147483648, %v471_v3  ;;  %v481_v9 = vand.u32 2147483647, %v471_v3  ;;  %vm477_vm4 = vweird.f32 %v471_v3 }
 0x224   : > { %v619_v63 = vadd.f32 %v1681_v61, %v618_v62  ;;  %v1561_v61 = vld [vmem:[%s2535_s2 + $0xf0] sm:$0xff] }
 0x225   : > { %v484_v11 = vor.u32 1.1754944e-38, %v483_v7  ;;  %vm482_vm6 = vcmp.eq.f32.partialorder %v481_v9, 8.507059e+37  ;;  %v1553_v62 = vld [vmem:[%s2534_s1 + $0x110] sm:$0xff] }
 0x226   : > { %690 = vmatpush.msra.mxu2 %v619_v63  ;;  %v1552_v63 = vld [vmem:[%s2534_s1 + $0x108] sm:$0xff] }
 0x229   : > { %v1695_v4 = vpop.eup %1694 }
 0x22a   : > { %v473_v5 = vmul.f32 %v1695_v4, %v471_v3  ;;  %vm478_vm3 = vweird.f32 %v1695_v4  ;;  %v1504_v3 = vld [vmem:[%s2540_s7 + $0x18] sm:$0xff] }
 0x22b   : > { %vm479_vm5 = vmor %vm477_vm4, %vm478_vm3 }
 0x22c   : > { %v474_v6 = vsub.f32 1.0, %v473_v5 }
 0x22e   : > { %v475_v8 = vmul.f32 %v1695_v4, %v474_v6 }
 0x230   : > { %v476_v10 = vadd.f32 %v1695_v4, %v475_v8 }
 0x232   : > { %v480_v12 = vsel %vm479_vm5, %v1695_v4, %v476_v10 }
 0x233   : > { %v485_v13 = vsel %vm482_vm6, %v484_v11, %v480_v12  ;;  %v1682_v12 = vld [vmem:[%s2538_s5 + $0x2] ss:$0 sm:$0xff] }
 0x234   : > { %v486_v14 = vmul.f32 %v1986_v42, %v485_v13  ;;  %v1513_v42 = vld [vmem:[%s2534_s1 + $0xd0] sm:$0xff] }
 0x235   : > { %769 = vmatpush.msra.mxu0 %v1513_v42 }
 0x236   : > { %v487_v15 = vmul.f32 0.1118034, %v486_v14 }
 0x237   : > { %770 = vmatpush.msra.mxu0 %v1512_v44  ;;  %v1684_v44 = vld [vmem:[%s2539_s6 + $0x2] ss:$0 sm:$0xff] }
 0x238   : > { %1463 = vmatmul.msk.f32.vlgmr.msrb.gmra.mxu3 %vm462_vm2, %v487_v15 }
 0x239   : > { %771 = vmatpush.msra.mxu0 %v1511_v46  ;;  %715 = vmatpush.msrb.mxu3 %v1504_v3  ;;  %v1550_v3 = vld [vmem:[%s2534_s1 + $0xf8] sm:$0xff] }
 0x23a   : > { %v813_v14 = vpop.f32.mrf.mxu1 }
 0x23b   : > { %772 = vmatpush.msra.mxu0 %v1510_v48  ;;  %v814_v17 = vadd.f32 %v1682_v12, %v813_v14  ;;  %716 = vmatpush.msrb.mxu3 %v1503_v24  ;;  %v1569_v48 = vld [vmem:[%s2535_s2 + $0x130] sm:$0xff] }
 0x23d   : > { %773 = vmatpush.msra.mxu0 %v1509_v50  ;;  %v1567_v50 = vld [vmem:[%s2535_s2 + $0x120] sm:$0xff] }
 0x23f   : > { %774 = vmatpush.msra.mxu0 %v1508_v52  ;;  %v1558_v52 = vld [vmem:[%s2534_s1 + $0x138] sm:$0xff] }
 0x240   : > { %1475 = vmatmul.msk.f32.vlgmr.msra.gmra.mxu3 %vm343_vm0, %v1939_v20  ;;  %975 = vmatpush.msrb.mxu1 %v1558_v52  ;;  %v1598_v52 = vld [vmem:[%s2534_s1 + $0x178] sm:$0xff] }
 0x241   : > { %775 = vmatpush.msra.mxu0 %v1507_v54  ;;  %838 = vmatpush.msra.mxu3 %v1540_v25  ;;  %v1557_v54 = vld [vmem:[%s2534_s1 + $0x130] sm:$0xff] }
 0x242   : > { %1518 = vmatmul.msk.f32.vlgmr.msra.gmra.mxu0 %vm343_vm0, %v1939_v20  ;;  %976 = vmatpush.msrb.mxu1 %v1557_v54  ;;  %v1597_v54 = vld [vmem:[%s2534_s1 + $0x170] sm:$0xff] }
 0x2bb   : > { %v2063_v19 = vpop.f32.mrf.mxu3 }
 0x2c3   : > { %v546_v22 = vpop.f32.mrf.mxu3 }
 0x2c4   : > { %v547_v23 = vadd.f32 %v1680_v21, %v546_v22  ;;  %v1683_v21 = vld [vmem:[%s2537_s4 + $0x2] ss:$0 sm:$0xff]  ;;  %v777_v22 = vpop.f32.mrf.mxu0 }
 0x2c6   : > { %1501 = vmatmul.msk.f32.vlgmr.msrb.gmra.mxu2 %vm435_vm1, %v547_v23  ;;  %v778_v23 = vadd.f32 %v1683_v21, %v777_v22  ;;  %v1685_v21 = vld [vmem:[%s2538_s5 + $0x3] ss:$0 sm:$0xff] }
 0x2c7   : > { %738 = vmatpush.msrb.mxu2 %v512_v0  ;;  %v1551_v0 = vld [vmem:[%s2534_s1 + $0x100] sm:$0xff] }
 0x2c8   : > { %v1686_v22 = vld [vmem:[%s2537_s4 + $0x3] ss:$0 sm:$0xff] }
 0x2c9   : > { %739 = vmatpush.msrb.mxu2 %v511_v1  ;;  %v1547_v1 = vld [vmem:[%s2540_s7 + $0x28] sm:$0xff] }
 0x2ca   : > { %946 = vmatpush.msrb.mxu0 %v1547_v1 }
 0x349   : > { %v2075_v26 = vpop.f32.mrf.mxu2 }
 0x34a   : > { %v647_v27 = vsel %vm462_vm2, %v2075_v26, -inf }
 0x34b   : > { %648 = vmax.xlane.f32.xlu1 %v647_v27  ;;  %v1537_v27 = vld [vmem:[%s2536_s3 + $0xd0] sm:$0xff] }
 0x3be   : > { %v649_v56 = vpop.xlane.xlu1 %648 }
 0x3bf   : > { %v650_v57 = vsub.f32 %v2075_v26, %v649_v56  ;;  %v1538_v26 = vld [vmem:[%s2536_s3 + $0xd8] sm:$0xff]  ;;  %v1556_v56 = vld [vmem:[%s2534_s1 + $0x128] sm:$0xff] }
 0x3c0   : > { %977 = vmatpush.msrb.mxu1 %v1556_v56  ;;  %v1596_v56 = vld [vmem:[%s2534_s1 + $0x168] sm:$0xff] }
 0x3c1   : > { %v651_v58 = vmul.f32 1.442695, %v650_v57  ;;  %v1563_v57 = vld [vmem:[%s2535_s2 + $0x100] sm:$0xff] }
 0x3c3   : > { %1696 = vpow2.f32 %v651_v58  ;;  %v1555_v58 = vld [vmem:[%s2534_s1 + $0x120] sm:$0xff] }
 0x3c4   : > { %978 = vmatpush.msrb.mxu1 %v1555_v58  ;;  %v1595_v58 = vld [vmem:[%s2534_s1 + $0x160] sm:$0xff] }
 0x3c9   : > { %v1697_v59 = vpop.eup %1696 }
 0x3ca   : > { %v653_v60 = vsel %vm462_vm2, %v1697_v59, 0.0 }
 0x3cb   : > { %654 = vadd.xlane.f32.xlu1 %v653_v60  ;;  %v1554_v60 = vld [vmem:[%s2534_s1 + $0x118] sm:$0xff] }
 0x3cc   : > { %979 = vmatpush.msrb.mxu1 %v1554_v60  ;;  %v1594_v60 = vld [vmem:[%s2534_s1 + $0x158] sm:$0xff] }
 0x3ce   : > { %980 = vmatpush.msrb.mxu1 %v1553_v62  ;;  %v1593_v62 = vld [vmem:[%s2534_s1 + $0x150] sm:$0xff] }
 0x3d0   : > { %981 = vmatpush.msrb.mxu1 %v1552_v63  ;;  %v1687_v63 = vld [vmem:[%s2539_s6 + $0x3] ss:$0 sm:$0xff] }
 0x3d2   : > { %982 = vmatpush.msrb.mxu1 %v1551_v0  ;;  %v1603_v0 = vld [vmem:[%s2535_s2 + $0x140] sm:$0xff] }
 0x3d4   : > { %983 = vmatpush.msrb.mxu1 %v1550_v3 }
 0x43e   : > { %v655_v2 = vpop.xlane.xlu1 %654 }
 0x43f   : > { %1698 = vrcp.f32 %v655_v2  ;;  %v667_v7 = vand.u32 2147483648, %v655_v2  ;;  %v665_v9 = vand.u32 2147483647, %v655_v2  ;;  %vm661_vm8 = vweird.f32 %v655_v2 }
 0x441   : > { %v668_v11 = vor.u32 1.1754944e-38, %v667_v7  ;;  %vm666_vm10 = vcmp.eq.f32.partialorder %v665_v9, 8.507059e+37 }
 0x445   : > { %v1699_v4 = vpop.eup %1698 }
 0x446   : > { %v657_v5 = vmul.f32 %v1699_v4, %v655_v2  ;;  %vm662_vm7 = vweird.f32 %v1699_v4 }
 0x447   : > { %vm663_vm9 = vmor %vm661_vm8, %vm662_vm7 }
 0x448   : > { %v658_v6 = vsub.f32 1.0, %v657_v5 }
 0x44a   : > { %v659_v8 = vmul.f32 %v1699_v4, %v658_v6 }
 0x44c   : > { %v660_v10 = vadd.f32 %v1699_v4, %v659_v8 }
 0x44e   : > { %v664_v13 = vsel %vm663_vm9, %v1699_v4, %v660_v10  ;;  %v1549_v4 = vld [vmem:[%s2534_s1 + $0xf0] sm:$0xff] }
 0x44f   : > { %v669_v15 = vsel %vm666_vm10, %v668_v11, %v664_v13  ;;  %984 = vmatpush.msrb.mxu1 %v1549_v4  ;;  %v1591_v4 = vld [vmem:[%s2534_s1 + $0x140] sm:$0xff] }
 0x450   : > { %v670_v16 = vmul.f32 %v1697_v59, %v669_v15  ;;  %v1562_v59 = vld [vmem:[%s2535_s2 + $0xf8] sm:$0xff]  ;;  %1560 = vmatmul.msk.f32.vlgmr.msrb.gmra.mxu1 %vm343_vm0, %v1939_v20 }
 0x452   : > { %v671_v18 = vmul.f32 0.1118034, %v670_v16 }
 0x454   : > { %1502 = vmatmul.msk.f32.vlgmr.msra.gmra.mxu2 %vm462_vm2, %v671_v18 }
 0x455   : > { %1543 = vmatpush.xpose.msk.msra.mxu2 %vm435_vm1, %v814_v17  ;;  %v1546_v17 = vld [vmem:[%s2540_s7 + $0x20] sm:$0xff] }
 0x456   : > { %947 = vmatpush.msrb.mxu0 %v1546_v17 }
 0x45c   : > { %1506 = vmatmul.msk.f32.vlgmr.msrb.gmra.mxu2 %vm435_vm1, %v2063_v19  ;;  %v1539_v19 = vld [vmem:[%s2536_s3 + $0xe0] sm:$0xff] }
 0x45d   : > { %839 = vmatpush.msra.mxu3 %v1539_v19 }
 0x45f   : > { %840 = vmatpush.msra.mxu3 %v1538_v26  ;;  %v1582_v26 = vld [vmem:[%s2536_s3 + $0x138] sm:$0xff] }
 0x461   : > { %841 = vmatpush.msra.mxu3 %v1537_v27  ;;  %v1581_v27 = vld [vmem:[%s2536_s3 + $0x130] sm:$0xff] }
 0x463   : > { %842 = vmatpush.msra.mxu3 %v1536_v28  ;;  %v1580_v28 = vld [vmem:[%s2536_s3 + $0x128] sm:$0xff] }
 0x464   : > { %1544 = vmatmul.msk.f32.vlgmr.msra.gmra.mxu2 %vm435_vm1, %v778_v23 }
 0x465   : > { %843 = vmatpush.msra.mxu3 %v1535_v29  ;;  %v1579_v29 = vld [vmem:[%s2536_s3 + $0x120] sm:$0xff] }
 0x467   : > { %844 = vmatpush.msra.mxu3 %v1534_v30 }
 0x469   : > { %845 = vmatpush.msra.mxu3 %v1533_v35  ;;  %v1577_v35 = vld [vmem:[%s2536_s3 + $0x110] sm:$0xff] }
 0x46b   : > { %846 = vmatpush.msra.mxu3 %v1532_v36  ;;  %v1576_v36 = vld [vmem:[%s2536_s3 + $0x108] sm:$0xff] }
 0x46d   : > { %847 = vmatpush.msra.mxu3 %v1531_v37  ;;  %v1575_v37 = vld [vmem:[%s2536_s3 + $0x100] sm:$0xff] }
 0x4cd   : > { %v986_v23 = vpop.f32.mrf.mxu1 }
 0x4ce   : > { %v987_v19 = vadd.f32 %v1686_v22, %v986_v23  ;;  %v1688_v22 = vld [vmem:[%s2538_s5 + $0x4] ss:$0 sm:$0xff] }
 0x4d7   : > { %v692_v31 = vpop.f32.mrf.mxu2 }
 0x4d8   : > { %1505 = vmatmul.msk.f32.vlgmr.msrb.gmra.mxu3 %vm435_vm1, %v692_v31 }
 0x4d9   : > { %1047 = vmatpush.msrb.mxu3 %v1582_v26 }
 0x4db   : > { %1048 = vmatpush.msrb.mxu3 %v1581_v27 }
 0x4dd   : > { %1049 = vmatpush.msrb.mxu3 %v1580_v28  ;;  %v1624_v28 = vld [vmem:[%s2536_s3 + $0x188] sm:$0xff] }
 0x4df   : > { %v2219_v32 = vpop.f32.mrf.mxu2  ;;  %1050 = vmatpush.msrb.mxu3 %v1579_v29 }
 0x4e0   : > { %1542 = vmatmul.msk.f32.vlgmr.msra.gmra.mxu3 %vm343_vm0, %v1939_v20 }
 0x4e7   : > { %v875_v33 = vpop.f32.mrf.mxu2 }
 0x4e8   : > { %v878_v34 = vsel %vm462_vm2, %v875_v33, -inf }
 0x4e9   : > { %879 = vmax.xlane.f32.xlu2 %v878_v34  ;;  %v1578_v34 = vld [vmem:[%s2536_s3 + $0x118] sm:$0xff] }
 0x4ea   : > { %1051 = vmatpush.msrb.mxu3 %v1578_v34 }
 0x4ec   : > { %1052 = vmatpush.msrb.mxu3 %v1577_v35 }
 0x4ee   : > { %1053 = vmatpush.msrb.mxu3 %v1576_v36 }
 0x4f0   : > { %1054 = vmatpush.msrb.mxu3 %v1575_v37  ;;  %v1623_v37 = vld [vmem:[%s2536_s3 + $0x180] sm:$0xff] }
 0x55b   : > { %v2237_v43 = vpop.f32.mrf.mxu3 }
 0x55c   : > { %v880_v38 = vpop.xlane.xlu2 %879  ;;  %v742_v29 = vadd.f32 %v2219_v32, %v2237_v43  ;;  %v1621_v32 = vld [vmem:[%s2536_s3 + $0x170] sm:$0xff]  ;;  %v1620_v43 = vld [vmem:[%s2536_s3 + $0x168] sm:$0xff] }
 0x55d   : > { %v881_v39 = vsub.f32 %v875_v33, %v880_v38  ;;  %v1574_v38 = vld [vmem:[%s2536_s3 + $0xf8] sm:$0xff] }
 0x55e   : > { %1055 = vmatpush.msrb.mxu3 %v1574_v38  ;;  %v1622_v38 = vld [vmem:[%s2536_s3 + $0x178] sm:$0xff] }
 0x55f   : > { %v882_v40 = vmul.f32 1.442695, %v881_v39  ;;  %v1573_v39 = vld [vmem:[%s2536_s3 + $0xf0] sm:$0xff] }
 0x560   : > { %1056 = vmatpush.msrb.mxu3 %v1573_v39  ;;  %v1618_v39 = vld [vmem:[%s2536_s3 + $0x158] sm:$0xff] }
 0x561   : > { %1700 = vpow2.f32 %v882_v40  ;;  %v1612_v40 = vld [vmem:[%s2535_s2 + $0x188] sm:$0xff]  ;;  %1584 = vmatmul.msk.f32.vlgmr.msrb.gmra.mxu3 %vm343_vm0, %v1939_v20 }
 0x562   : > { %1220 = vmatpush.msra.mxu3 %v1612_v40  ;;  %v1617_v40 = vld [vmem:[%s2536_s3 + $0x150] sm:$0xff] }
 0x563   : > { %v849_v45 = vpop.f32.mrf.mxu3 }
 0x564   : > { %v850_v46 = vadd.f32 %v1684_v44, %v849_v45 }
 0x566   : > { %921 = vmatpush.msrb.mxu2 %v850_v46 }
 0x567   : > { %v2233_v41 = vpop.eup %1700 }
 0x568   : > { %v884_v42 = vsel %vm462_vm2, %v2233_v41, 0.0  ;;  %1011 = vmatpush.msra.mxu2 %v1570_v47  ;;  %v1611_v47 = vld [vmem:[%s2535_s2 + $0x180] sm:$0xff] }
 0x569   : > { %885 = vadd.xlane.f32.xlu2 %v884_v42  ;;  %1221 = vmatpush.msra.mxu3 %v1611_v47 }
 0x56a   : > { %1012 = vmatpush.msra.mxu2 %v1569_v48  ;;  %v1600_v48 = vld [vmem:[%s2534_s1 + $0x188] sm:$0xff] }
 0x56c   : > { %1013 = vmatpush.msra.mxu2 %v1568_v49  ;;  %v1610_v49 = vld [vmem:[%s2535_s2 + $0x178] sm:$0xff] }
 0x56d   : > { %1222 = vmatpush.msra.mxu3 %v1610_v49  ;;  %v1690_v49 = vld [vmem:[%s2539_s6 + $0x4] ss:$0 sm:$0xff] }
 0x56e   : > { %1014 = vmatpush.msra.mxu2 %v1567_v50  ;;  %v1599_v50 = vld [vmem:[%s2534_s1 + $0x180] sm:$0xff] }
 0x570   : > { %1015 = vmatpush.msra.mxu2 %v1566_v51  ;;  %v1609_v51 = vld [vmem:[%s2535_s2 + $0x170] sm:$0xff] }
 0x571   : > { %1223 = vmatpush.msra.mxu3 %v1609_v51 }
 0x572   : > { %1016 = vmatpush.msra.mxu2 %v1565_v53  ;;  %v1608_v53 = vld [vmem:[%s2535_s2 + $0x168] sm:$0xff] }
 0x573   : > { %1224 = vmatpush.msra.mxu3 %v1608_v53 }
 0x574   : > { %1017 = vmatpush.msra.mxu2 %v1564_v55  ;;  %v1607_v55 = vld [vmem:[%s2535_s2 + $0x160] sm:$0xff] }
 0x575   : > { %1225 = vmatpush.msra.mxu3 %v1607_v55 }
 0x576   : > { %1018 = vmatpush.msra.mxu2 %v1563_v57  ;;  %v1606_v57 = vld [vmem:[%s2535_s2 + $0x158] sm:$0xff] }
 0x577   : > { %1226 = vmatpush.msra.mxu3 %v1606_v57 }
 0x578   : > { %1019 = vmatpush.msra.mxu2 %v1562_v59  ;;  %v1605_v59 = vld [vmem:[%s2535_s2 + $0x150] sm:$0xff] }
 0x579   : > { %1227 = vmatpush.msra.mxu3 %v1605_v59 }
 0x57a   : > { %1020 = vmatpush.msra.mxu2 %v1561_v61  ;;  %v1604_v61 = vld [vmem:[%s2535_s2 + $0x148] sm:$0xff] }
 0x57b   : > { %1228 = vmatpush.msra.mxu3 %v1604_v61 }
 0x57d   : > { %1229 = vmatpush.msra.mxu3 %v1603_v0 }
 0x57e   : > { %1614 = vmatmul.msk.f32.vlgmr.msra.gmra.mxu3 %vm343_vm0, %v1939_v20 }
 0x5dc   : > { %v886_v2 = vpop.xlane.xlu2 %885 }
 0x5dd   : > { %1702 = vrcp.f32 %v886_v2  ;;  %v898_v8 = vand.u32 2147483648, %v886_v2  ;;  %v896_v10 = vand.u32 2147483647, %v886_v2  ;;  %vm892_vm12 = vweird.f32 %v886_v2 }
 0x5df   : > { %v899_v12 = vor.u32 1.1754944e-38, %v898_v8  ;;  %vm897_vm14 = vcmp.eq.f32.partialorder %v896_v10, 8.507059e+37 }
 0x5e3   : > { %v1703_v5 = vpop.eup %1702 }
 0x5e4   : > { %v888_v6 = vmul.f32 %v1703_v5, %v886_v2  ;;  %vm893_vm11 = vweird.f32 %v1703_v5  ;;  %v1058_v1 = vpop.f32.mrf.mxu3  ;;  %v1592_v2 = vld [vmem:[%s2534_s1 + $0x148] sm:$0xff] }
 0x5e5   : > { %vm894_vm13 = vmor %vm892_vm12, %vm893_vm11  ;;  %v1059_v3 = vadd.f32 %v1687_v63, %v1058_v1  ;;  %v1630_v1 = vld [vmem:[%s2540_s7 + $0x40] sm:$0xff] }
 0x5e6   : > { %v889_v7 = vsub.f32 1.0, %v888_v6 }
 0x5e8   : > { %v890_v9 = vmul.f32 %v1703_v5, %v889_v7 }
 0x5ea   : > { %v891_v11 = vadd.f32 %v1703_v5, %v890_v9 }
 0x5ec   : > { %v895_v13 = vsel %vm894_vm13, %v1703_v5, %v891_v11  ;;  %v1589_v5 = vld [vmem:[%s2540_s7 + $0x38] sm:$0xff] }
 0x5ed   : > { %v900_v14 = vsel %vm897_vm14, %v899_v12, %v895_v13  ;;  %1155 = vmatpush.msra.mxu1 %v1589_v5 }
 0x5ee   : > { %v901_v15 = vmul.f32 %v2233_v41, %v900_v14 }
 0x5f0   : > { %v902_v16 = vmul.f32 0.1118034, %v901_v15 }
 0x5f2   : > { %1545 = vmatmul.msk.f32.vlgmr.msrb.gmra.mxu2 %vm462_vm2, %v902_v16 }
 0x5f3   : > { %1184 = vmatpush.msrb.mxu2 %v1600_v48 }
 0x5f5   : > { %1185 = vmatpush.msrb.mxu2 %v1599_v50 }
 0x5f7   : > { %1186 = vmatpush.msrb.mxu2 %v1598_v52  ;;  %v1631_v52 = vld [vmem:[%s2540_s7 + $0x48] sm:$0xff] }
 0x5f9   : > { %1187 = vmatpush.msrb.mxu2 %v1597_v54 }
 0x5fa   : > { %1572 = vmatmul.msk.f32.vlgmr.msra.gmra.mxu2 %vm343_vm0, %v1939_v20 }
 0x5fb   : > { %1188 = vmatpush.msrb.mxu2 %v1596_v56 }
 0x5fd   : > { %1189 = vmatpush.msrb.mxu2 %v1595_v58 }
 0x5ff   : > { %1190 = vmatpush.msrb.mxu2 %v1594_v60 }
 0x601   : > { %1191 = vmatpush.msrb.mxu2 %v1593_v62  ;;  %v1231_v23 = vpop.f32.mrf.mxu3 }
 0x603   : > { %1192 = vmatpush.msrb.mxu2 %v1592_v2 }
 0x605   : > { %1193 = vmatpush.msrb.mxu2 %v1591_v4 }
 0x606   : > { %1602 = vmatmul.msk.f32.vlgmr.msrb.gmra.mxu2 %vm343_vm0, %v1939_v20 }
 0x607   : > { %1364 = vmatpush.msra.mxu2 %v1631_v52 }
 0x609   : > { %1365 = vmatpush.msra.mxu2 %v1630_v1 }
 0x675   : > { %v923_v18 = vpop.f32.mrf.mxu2 }
 0x676   : > { %1548 = vmatmul.msk.f32.vlgmr.msrb.gmra.mxu0 %vm435_vm1, %v923_v18 }
 0x67d   : > { %v1022_v24 = vpop.f32.mrf.mxu2 }
 0x67e   : > { %v1023_v25 = vadd.f32 %v1685_v21, %v1022_v24  ;;  %v1588_v21 = vld [vmem:[%s2540_s7 + $0x30] sm:$0xff]  ;;  %v1232_v24 = vadd.f32 %v1688_v22, %v1231_v23 }
 0x67f   : > { %1156 = vmatpush.msra.mxu1 %v1588_v21 }
 0x680   : > { %1585 = vmatpush.xpose.msk.msra.mxu0 %vm435_vm1, %v1023_v25 }
 0x681   : > { %1627 = vmatpush.xpose.msk.msrb.mxu1 %vm435_vm1, %v1232_v24 }
 0x683   : > { %1586 = vmatmul.msk.f32.vlgmr.msra.gmra.mxu0 %vm435_vm1, %v987_v19  ;;  %v1689_v19 = vld [vmem:[%s2537_s4 + $0x4] ss:$0 sm:$0xff] }
 0x684   : > { %1130 = vmatpush.msrb.mxu0 %v1059_v3  ;;  %v1691_v3 = vld [vmem:[%s2541_s8] ss:$0 sm:$0xff] }
 0x686   : > { %1256 = vmatpush.msra.mxu0 %v1624_v28 }
 0x688   : > { %1257 = vmatpush.msra.mxu0 %v1623_v37 }
 0x689   : > { %v1195_v26 = vpop.f32.mrf.mxu2 }
 0x68a   : > { %v1196_v27 = vadd.f32 %v1689_v19, %v1195_v26  ;;  %1258 = vmatpush.msra.mxu0 %v1622_v38 }
 0x68c   : > { %1259 = vmatpush.msra.mxu0 %v1621_v32 }
 0x68e   : > { %1260 = vmatpush.msra.mxu0 %v1620_v43 }
 0x6f3   : > { %v2335_v30 = vpop.f32.mrf.mxu0 }
 0x700   : > { %v1084_v31 = vpop.f32.mrf.mxu0 }
 0x701   : > { %v1087_v33 = vsel %vm462_vm2, %v1084_v31, -inf }
 0x702   : > { %1088 = vmax.xlane.f32.xlu0 %v1087_v33 }
 0x775   : > { %v1089_v41 = vpop.xlane.xlu0 %1088 }
 0x776   : > { %v1090_v42 = vsub.f32 %v1084_v31, %v1089_v41  ;;  %v952_v31 = vadd.f32 %v2335_v30, %v742_v29  ;;  %v1619_v30 = vld [vmem:[%s2536_s3 + $0x160] sm:$0xff]  ;;  %v1616_v41 = vld [vmem:[%s2536_s3 + $0x148] sm:$0xff] }
 0x777   : > { %1261 = vmatpush.msra.mxu0 %v1619_v30 }
 0x778   : > { %v1091_v44 = vmul.f32 1.442695, %v1090_v42  ;;  %v1615_v42 = vld [vmem:[%s2536_s3 + $0x140] sm:$0xff] }
 0x779   : > { %1262 = vmatpush.msra.mxu0 %v1618_v39 }
 0x77a   : > { %1704 = vpow2.f32 %v1091_v44 }
 0x77b   : > { %1263 = vmatpush.msra.mxu0 %v1617_v40 }
 0x77d   : > { %1264 = vmatpush.msra.mxu0 %v1616_v41 }
 0x77f   : > { %1265 = vmatpush.msra.mxu0 %v1615_v42 }
 0x780   : > { %v2361_v45 = vpop.eup %1704 }
 0x781   : > { %v1093_v46 = vsel %vm462_vm2, %v2361_v45, 0.0 }
 0x782   : > { %1094 = vadd.xlane.f32.xlu1 %v1093_v46 }
 0x7f5   : > { %v1095_v6 = vpop.xlane.xlu1 %1094 }
 0x7f6   : > { %1706 = vrcp.f32 %v1095_v6  ;;  %v1107_v10 = vand.u32 2147483648, %v1095_v6  ;;  %v1105_v12 = vand.u32 2147483647, %v1095_v6  ;;  %vm1101_vm3 = vweird.f32 %v1095_v6 }
 0x7f8   : > { %v1108_v14 = vor.u32 1.1754944e-38, %v1107_v10  ;;  %vm1106_vm5 = vcmp.eq.f32.partialorder %v1105_v12, 8.507059e+37 }
 0x7fc   : > { %v1707_v7 = vpop.eup %1706 }
 0x7fd   : > { %v1097_v8 = vmul.f32 %v1707_v7, %v1095_v6  ;;  %vm1102_vm15 = vweird.f32 %v1707_v7 }
 0x7fe   : > { %vm1103_vm4 = vmor %vm1101_vm3, %vm1102_vm15 }
 0x7ff   : > { %v1098_v9 = vsub.f32 1.0, %v1097_v8 }
 0x801   : > { %v1099_v11 = vmul.f32 %v1707_v7, %v1098_v9 }
 0x803   : > { %v1100_v13 = vadd.f32 %v1707_v7, %v1099_v11 }
 0x805   : > { %v1104_v15 = vsel %vm1103_vm4, %v1707_v7, %v1100_v13 }
 0x806   : > { %v1109_v16 = vsel %vm1106_vm5, %v1108_v14, %v1104_v15 }
 0x807   : > { %v1110_v17 = vmul.f32 %v2361_v45, %v1109_v16 }
 0x809   : > { %v1111_v18 = vmul.f32 0.1118034, %v1110_v17 }
 0x80b   : > { %1587 = vmatmul.msk.f32.vlgmr.msrb.gmra.mxu0 %vm462_vm2, %v1111_v18 }
 0x813   : > { %1626 = vmatmul.msk.f32.vlgmr.msra.gmra.mxu0 %vm343_vm0, %v1939_v20 }
 0x888   : > { %v1132_v25 = vpop.f32.mrf.mxu0 }
 0x889   : > { %1590 = vmatmul.msk.f32.vlgmr.msra.gmra.mxu1 %vm435_vm1, %v1132_v25 }
 0x890   : > { %v1267_v50 = vpop.f32.mrf.mxu0 }
 0x891   : > { %1628 = vmatmul.msk.f32.vlgmr.msrb.gmra.mxu1 %vm435_vm1, %v1196_v27  ;;  %v1268_v51 = vadd.f32 %v1690_v49, %v1267_v50 }
 0x893   : > { %1339 = vmatpush.msra.mxu1 %v1268_v51 }
 0x906   : > { %v1158_v33 = vpop.f32.mrf.mxu1 }
 0x907   : > { %v2452_v34 = vadd.f32 %v1158_v33, %v952_v31 }
 0x90e   : > { %v1293_v35 = vpop.f32.mrf.mxu1 }
 0x90f   : > { %v1296_v36 = vsel %vm462_vm2, %v1293_v35, -inf }
 0x910   : > { %1297 = vmax.xlane.f32.xlu2 %v1296_v36 }
 0x983   : > { %v1298_v44 = vpop.xlane.xlu2 %1297 }
 0x984   : > { %v1299_v45 = vsub.f32 %v1293_v35, %v1298_v44 }
 0x986   : > { %v1300_v46 = vmul.f32 1.442695, %v1299_v45 }
 0x988   : > { %1708 = vpow2.f32 %v1300_v46 }
 0x98e   : > { %v1709_v47 = vpop.eup %1708 }
 0x98f   : > { %v1302_v48 = vsel %vm462_vm2, %v1709_v47, 0.0 }
 0x990   : > { %1303 = vadd.xlane.f32.xlu0 %v1302_v48 }
 0xa03   : > { %v1304_v20 = vpop.xlane.xlu0 %1303 }
 0xa04   : > { %1710 = vrcp.f32 %v1304_v20  ;;  %v1316_v56 = vand.u32 2147483648, %v1304_v20  ;;  %v1314_v58 = vand.u32 2147483647, %v1304_v20  ;;  %vm1310_vm7 = vweird.f32 %v1304_v20 }
 0xa06   : > { %v1317_v60 = vor.u32 1.1754944e-38, %v1316_v56  ;;  %vm1315_vm9 = vcmp.eq.f32.partialorder %v1314_v58, 8.507059e+37 }
 0xa0a   : > { %v1711_v53 = vpop.eup %1710 }
 0xa0b   : > { %v1306_v54 = vmul.f32 %v1711_v53, %v1304_v20  ;;  %vm1311_vm6 = vweird.f32 %v1711_v53 }
 0xa0c   : > { %vm1312_vm8 = vmor %vm1310_vm7, %vm1311_vm6 }
 0xa0d   : > { %v1307_v55 = vsub.f32 1.0, %v1306_v54 }
 0xa0f   : > { %v1308_v57 = vmul.f32 %v1711_v53, %v1307_v55 }
 0xa11   : > { %v1309_v59 = vadd.f32 %v1711_v53, %v1308_v57 }
 0xa13   : > { %v1313_v61 = vsel %vm1312_vm8, %v1711_v53, %v1309_v59 }
 0xa14   : > { %v1318_v62 = vsel %vm1315_vm9, %v1317_v60, %v1313_v61 }
 0xa15   : > { %v1319_v63 = vmul.f32 %v1709_v47, %v1318_v62 }
 0xa17   : > { %v1320_v0 = vmul.f32 0.1118034, %v1319_v63 }
 0xa19   : > { %1629 = vmatmul.msk.f32.vlgmr.msra.gmra.mxu1 %vm462_vm2, %v1320_v0 }
 0xa96   : > { %v1341_v2 = vpop.f32.mrf.mxu1 }
 0xa97   : > { %1632 = vmatmul.msk.f32.vlgmr.msra.gmra.mxu2 %vm435_vm1, %v1341_v2 }
 0xb1a   : > { %v1367_v4 = vpop.f32.mrf.mxu2 }
 0xb1b   : > { %v1370_v5 = vadd.f32 %v1367_v4, %v2452_v34 }
 0xb1d   : > { %v1375_v6 = vadd.f32 %v1691_v3, %v1370_v5 }
 0xb1f   : > { %1376 = vst.msk [vmem:[%s323_s26] sm:$0xff] %vm343_vm0, %v1375_v6 }
 0xb20   : > { %1739 = shalt.err (!%p1736_p3)
}
 0xb21   : > { %1637 = dma.vmem_to_hbm [thread:$0]  (%p1864_p5), %s1391_s27, 128, %s1393_s28, %s1378_s13  }
 0xb22 PF: > { %p1643_p4 = scmp.ge.s32.totalorder %s1774_s12, 2  ;;  %s1404_s14 = sand.u32 1, %s1762_s30  }
 0xb23   : > { %s1405_s25 = scalar_lea.sflag [#allocation3], %s1404_s14 }
 0xb24   : > { %p1640_p7 = pnand %p1643_p4, %p1868_p6 }
 0xb26   : > { %p1641_p8 = pneg %p1640_p7 }
 0xb28   : > { %1757 = dma.done.wait (%p1641_p8), %s1405_s25, 128  }
 0xb29   : > { %1759 = vsyncadd (%p1641_p8), %s1405_s25, 4294967168  ;;  %p19_p9 = scmp.ge.s32.totalorder %s1851_s15, 4   ;;  %s2545_s30 = smov %s1766_s10 }
 0xb2a   : > { %s2546_s10 = smov %s1770_s11  ;;  %s2547_s11 = smov %s1862_s18 }
 0xb2b   : > { %s2548_s12 = smov %s1851_s15  ;;  %21 = sbr.rel (!%p19_p9) target bundleno = 3 (0x3), region = 119 }
 0xb30   :  { %1411 = vsyncpa [#allocation3], 1 }
 0xb31   :  { %1413 = vsyncpa [#allocation3 + $0x1], 1 }

</bundles_post_ra>
